<compile_context>
chip_gen: v6e
topology: v6e:2x2x1
jax: 0.10.0
libtpu: 0.0.40
codegen_flags: <defaults>
</compile_context>

<pallas_src>
import functools

import numpy as np
import jax
import jax.numpy as jnp
from jax import lax
from jax.experimental import pallas as pl
from jax.experimental.pallas import tpu as pltpu

NEG_SLOPE = 0.01   # nn.LeakyReLU default used by the reference module
LANE = 128         # pad head output channels to a full lane width


# ---------------------------------------------------------------------------
# Host-side constant construction (done once, outside jit)
# ---------------------------------------------------------------------------
def _stacked_gather_mat(H, W, KH, KW, stride, pad):
    """S[(t*Mo + m_out), m_in] = 1 iff output m_out reads input m_in at tap t
    (rows left all-zero where the tap falls into the zero padding)."""
    Ho = (H + 2 * pad - KH) // stride + 1
    Wo = (W + 2 * pad - KW) // stride + 1
    Mo, Mi = Ho * Wo, H * W
    S = np.zeros((KH * KW * Mo, Mi), np.float32)
    for ki in range(KH):
        for kj in range(KW):
            t = ki * KW + kj
            for oh in range(Ho):
                ih = oh * stride + ki - pad
                if not (0 <= ih < H):
                    continue
                for ow in range(Wo):
                    iw = ow * stride + kj - pad
                    if not (0 <= iw < W):
                        continue
                    S[t * Mo + oh * Wo + ow, ih * W + iw] = 1.0
    return S, Ho, Wo


def _stack_weight(w_oihw, pad_cout_to=None):
    """(Cout, Cin, KH, KW) -> (KH*KW*Cin, Cout); row index = (ki*KW+kj)*Cin + c."""
    Cout, Cin, KH, KW = w_oihw.shape
    w = np.transpose(np.asarray(w_oihw, np.float32), (2, 3, 1, 0))
    w = w.reshape(KH * KW * Cin, Cout)
    if pad_cout_to is not None and pad_cout_to > Cout:
        w = np.pad(w, ((0, 0), (0, pad_cout_to - Cout)))
    return w


def _conv1_offsets_and_mask(F, block_b):
    """Row-shift offsets and per-(row, tap) validity mask for the 3x3/s1/p1 head."""
    offs = []
    mask = np.zeros((F * F, 9), np.float32)
    for ki in range(3):
        for kj in range(3):
            di, dj = ki - 1, kj - 1
            offs.append(di * F + dj)
            t = ki * 3 + kj
            for i in range(F):
                for j in range(F):
                    if 0 <= i + di < F and 0 <= j + dj < F:
                        mask[i * F + j, t] = 1.0
    return tuple(offs), np.tile(mask, (block_b, 1))


def init_discriminator_params(key, image_size=16, conv_dim=8, c_dim=5, repeat_num=2):
    params = {}
    keys = jax.random.split(key, 2 * repeat_num + 2)
    in_c, out_c = 3, conv_dim
    for i in range(repeat_num):
        params[f"main{i}_w"] = 0.05 * jax.random.normal(
            keys[2 * i], (out_c, in_c, 4, 4), jnp.float32)
        params[f"main{i}_b"] = 0.05 * jax.random.normal(
            keys[2 * i + 1], (out_c,), jnp.float32)
        in_c = out_c
        out_c = out_c * 2
    curr_dim = in_c
    kernel_size = image_size // (2 ** repeat_num)
    params["conv1_w"] = 0.05 * jax.random.normal(
        keys[-2], (1, curr_dim, 3, 3), jnp.float32)
    params["conv2_w"] = 0.05 * jax.random.normal(
        keys[-1], (c_dim + 2, curr_dim, kernel_size, kernel_size), jnp.float32)
    return params


def pack_params(params, *, image_size, conv_dim, c_dim, repeat_num, block_b):
    """Precompute kernel-ready bf16 constants (stacked weights, gather mats, masks)."""
    assert image_size % (2 ** repeat_num) == 0
    packed = {"repeat_num": repeat_num, "image_size": image_size, "block_b": block_b}
    # Layer 0: im2col happens in the wrapper; only the stacked (48, C0) weight here.
    packed["w0"] = jnp.asarray(_stack_weight(params["main0_w"]), jnp.bfloat16)
    packed["b0"] = jnp.asarray(np.asarray(params["main0_b"], np.float32)[None, :])
    H = image_size // 2
    inner = []
    for i in range(1, repeat_num):
        S, Ho, _ = _stacked_gather_mat(H, H, 4, 4, stride=2, pad=1)
        w = _stack_weight(params[f"main{i}_w"])
        b = np.asarray(params[f"main{i}_b"], np.float32)[None, :]
        inner.append((jnp.asarray(S, jnp.bfloat16),
                      jnp.asarray(w, jnp.bfloat16),
                      jnp.asarray(b)))
        H = Ho
    packed["inner"] = inner
    F = H                                            # final feature map is F x F
    offs, mask1 = _conv1_offsets_and_mask(F, block_b)
    packed["offsets"] = offs
    packed["mask1"] = jnp.asarray(mask1, jnp.bfloat16)
    packed["w1"] = jnp.asarray(_stack_weight(params["conv1_w"], pad_cout_to=LANE),
                               jnp.bfloat16)
    packed["w2"] = jnp.asarray(_stack_weight(params["conv2_w"], pad_cout_to=LANE),
                               jnp.bfloat16)
    packed["final_hw"] = F
    packed["n_cls"] = params["conv2_w"].shape[0]
    return packed


def _unfold_stride2_4x4(x_nchw):
    """Wrapper-side im2col for the first conv (4x4, stride 2, pad 1).
    Returns (B*Ho*Wo, 48) with column index (ki*4 + kj)*3 + c."""
    B, C, H, W = x_nchw.shape
    Ho, Wo = H // 2, W // 2
    xp = jnp.pad(x_nchw, ((0, 0), (0, 0), (1, 1), (1, 1)))
    taps = []
    for ki in range(4):
        for kj in range(4):
            taps.append(xp[:, :, ki:ki + 2 * Ho - 1:2, kj:kj + 2 * Wo - 1:2])
    patches = jnp.stack(taps, axis=1)                       # (B, 16, C, Ho, Wo)
    patches = jnp.transpose(patches, (0, 3, 4, 1, 2))       # (B, Ho, Wo, 16, C)
    return patches.reshape(B * Ho * Wo, 16 * C), Ho * Wo


def _choose_block_b(B, max_block=8):
    """Images per grid step; keep >= 2 grid steps so both v7x TensorCores get work."""
    if B < 2:
        return 1
    target = max(1, min(max_block, B // 2))
    while B % target != 0:
        target -= 1
    return max(target, 1)


# ---------------------------------------------------------------------------
# Fused Pallas kernel (entire forward, one grid step = block_b images)
# ---------------------------------------------------------------------------
def _make_kernel(repeat_num, block_b, offsets, final_hw):
    n_inner = repeat_num - 1
    F = final_hw
    M_src = F * F
    pad_rows = ((F + 1 + 7) // 8) * 8          # sublane-aligned zero pad for conv1

    def leaky(a):
        return jnp.where(a >= 0.0, a, a * NEG_SLOPE)

    def kernel(*refs):
        cols0_ref, w0_ref, b0_ref = refs[0], refs[1], refs[2]
        idx = 3
        inner_refs = []
        for _ in range(n_inner):
            inner_refs.append((refs[idx], refs[idx + 1], refs[idx + 2]))
            idx += 3
        mask1_ref, w1_ref, w2_ref = refs[idx], refs[idx + 1], refs[idx + 2]
        out_src_ref, out_cls_ref = refs[idx + 3], refs[idx + 4]

        # ---- layer 0: ONE matmul, K = 48 (im2col done in the XLA wrapper) ----
        a = jnp.dot(cols0_ref[...], w0_ref[...], preferred_element_type=jnp.float32)
        h = leaky(a + b0_ref[...]).astype(jnp.bfloat16)       # (block_b*M0, C0)

        # ---- inner stride-2 convs: 1 stacked gather matmul + 1 compute matmul ----
        for (s_ref, w_ref, b_ref) in inner_refs:
            taps_mo, mi = s_ref.shape
            mo = taps_mo // 16
            cin = h.shape[-1]
            if block_b == 1:
                g = jnp.dot(s_ref[...], h, preferred_element_type=jnp.float32)
                g = g.astype(jnp.bfloat16)                     # (16*mo, cin)
                cols = jnp.concatenate(
                    [g[t * mo:(t + 1) * mo, :] for t in range(16)], axis=-1)
            else:
                h3 = h.reshape(block_b, mi, cin)
                sb = jnp.broadcast_to(s_ref[...], (block_b, taps_mo, mi))
                g = jnp.einsum('bom,bmc->boc', sb, h3,
                               preferred_element_type=jnp.float32)
                g = g.astype(jnp.bfloat16)                     # (block_b, 16*mo, cin)
                cols3 = jnp.concatenate(
                    [g[:, t * mo:(t + 1) * mo, :] for t in range(16)], axis=-1)
                cols = cols3.reshape(block_b * mo, 16 * cin)   # (block_b*mo, 16*cin)
            a = jnp.dot(cols, w_ref[...], preferred_element_type=jnp.float32)
            h = leaky(a + b_ref[...]).astype(jnp.bfloat16)     # (block_b*mo, cout)

        # ---- heads: h is (block_b*M_src, C_last) ----
        R, C = h.shape

        # conv1 (3x3 / s1 / p1): 9 static shifted slices + edge mask -> ONE matmul.
        zpad = jnp.zeros((pad_rows, C), jnp.bfloat16)
        hpad = jnp.concatenate([zpad, h, zpad], axis=0)
        parts = []
        for t, off in enumerate(offsets):
            sh = hpad[pad_rows + off: pad_rows + off + R, :]   # (R, C)
            parts.append(sh * mask1_ref[:, t:t + 1])
        cols1 = jnp.concatenate(parts, axis=-1)                # (R, 9*C)
        out_src_ref[...] = jnp.dot(cols1, w1_ref[...],
                                   preferred_element_type=jnp.float32)

        # conv2 (kernel = full map): flatten each image's features into one row,
        # then ONE matmul with K = M_src*C.
        rows = []
        for b in range(block_b):
            pieces = [h[b * M_src + m: b * M_src + m + 1, :] for m in range(M_src)]
            rows.append(jnp.concatenate(pieces, axis=-1))      # (1, M_src*C)
        hrow = rows[0] if block_b == 1 else jnp.concatenate(rows, axis=0)
        out_cls_ref[...] = jnp.dot(hrow, w2_ref[...],
                                   preferred_element_type=jnp.float32)

    return kernel


# ---------------------------------------------------------------------------
# Forward wrapper
# ---------------------------------------------------------------------------
def discriminator_forward(x_nchw, packed):
    B = x_nchw.shape[0]
    block_b = packed["block_b"]
    assert B % block_b == 0
    nblk = B // block_b
    repeat_num = packed["repeat_num"]
    F = packed["final_hw"]
    M_src = F * F

    # Layer-0 im2col in the wrapper (rec 1): (B*M0, 48) bf16, then block per grid step.
    cols0, M0 = _unfold_stride2_4x4(x_nchw.astype(jnp.float32))
    K0 = cols0.shape[-1]
    cols0 = cols0.astype(jnp.bfloat16).reshape(nblk, block_b * M0, K0)

    def const_spec(arr):
        shp = arr.shape
        # Constant index_map -> stays resident in VMEM across grid steps.
        # NOTE: pipeline_mode=pl.Buffered(1) could halve constant VMEM further.
        return pl.BlockSpec(shp, lambda b: (0,) * len(shp))

    ins = [cols0, packed["w0"], packed["b0"]]
    in_specs = [pl.BlockSpec((None, block_b * M0, K0), lambda b: (b, 0, 0)),
                const_spec(packed["w0"]), const_spec(packed["b0"])]
    for (S, w, bias) in packed["inner"]:
        ins += [S, w, bias]
        in_specs += [const_spec(S), const_spec(w), const_spec(bias)]
    ins += [packed["mask1"], packed["w1"], packed["w2"]]
    in_specs += [const_spec(packed["mask1"]), const_spec(packed["w1"]),
                 const_spec(packed["w2"])]

    out_shapes = (jax.ShapeDtypeStruct((nblk, block_b * M_src, LANE), jnp.float32),
                  jax.ShapeDtypeStruct((nblk, block_b, LANE), jnp.float32))
    out_specs = (pl.BlockSpec((None, block_b * M_src, LANE), lambda b: (b, 0, 0)),
                 pl.BlockSpec((None, block_b, LANE), lambda b: (b, 0, 0)))

    out_src_p, out_cls_p = pl.pallas_call(
        _make_kernel(repeat_num, block_b, packed["offsets"], F),
        grid=(nblk,),
        in_specs=in_specs,
        out_specs=out_specs,
        out_shape=out_shapes,
        compiler_params=pltpu.CompilerParams(
            dimension_semantics=("parallel",),
            vmem_limit_bytes=32 * 1024 * 1024),
    )(*ins)

    # Slice the lane-padded outputs back to the PyTorch shapes.
    out_src = out_src_p.reshape(B * M_src, LANE)[:, 0].reshape(B, 1, F, F)
    out_cls = out_cls_p.reshape(B, LANE)[:, :packed["n_cls"]]
    return out_src, out_cls


# ---------------------------------------------------------------------------
# Pure-JAX reference (f32) for correctness checking
# ---------------------------------------------------------------------------
def reference_forward(x, params, repeat_num):
    h = x
    for i in range(repeat_num):
        w = params[f"main{i}_w"]
        b = params[f"main{i}_b"]
        h = lax.conv_general_dilated(h, w, (2, 2), ((1, 1), (1, 1)),
                                     dimension_numbers=("NCHW", "OIHW", "NCHW"))
        h = h + b[None, :, None, None]
        h = jnp.where(h >= 0.0, h, NEG_SLOPE * h)
    src = lax.conv_general_dilated(h, params["conv1_w"], (1, 1), ((1, 1), (1, 1)),
                                   dimension_numbers=("NCHW", "OIHW", "NCHW"))
    cls = lax.conv_general_dilated(h, params["conv2_w"], (1, 1), "VALID",
                                   dimension_numbers=("NCHW", "OIHW", "NCHW"))
    return src, cls.reshape(cls.shape[0], cls.shape[1])


if __name__ == "__main__":
    IMG, CONV_DIM, C_DIM, REPEAT = 16, 8, 5, 2   # final feature map 4x4, 16 channels

    key = jax.random.PRNGKey(0)
    k_x, k_p = jax.random.split(key)
    params = init_discriminator_params(
        k_p, image_size=IMG, conv_dim=CONV_DIM, c_dim=C_DIM, repeat_num=REPEAT)

    def rel_err(a, b):
        return float(jnp.max(jnp.abs(a - b))) / max(1e-6, float(jnp.max(jnp.abs(b))))

    # B=4 exercises the batch-blocked path (block_b=2, 2 grid steps);
    # B=2 exercises the single-image-per-step path.
    for B in (4, 2):
        block_b = _choose_block_b(B)
        packed = pack_params(params, image_size=IMG, conv_dim=CONV_DIM, c_dim=C_DIM,
                             repeat_num=REPEAT, block_b=block_b)
        x = jax.random.normal(jax.random.fold_in(k_x, B), (B, 3, IMG, IMG), jnp.float32)

        fwd = jax.jit(functools.partial(discriminator_forward, packed=packed))
        out_src, out_cls = fwd(x)
        jax.block_until_ready((out_src, out_cls))

        F = IMG // (2 ** REPEAT)
        assert out_src.shape == (B, 1, F, F), out_src.shape
        assert out_cls.shape == (B, C_DIM + 2), out_cls.shape
        assert bool(jnp.all(jnp.isfinite(out_src))) and bool(jnp.all(jnp.isfinite(out_cls)))

        ref_src, ref_cls = reference_forward(x, params, REPEAT)
        e_src, e_cls = rel_err(out_src, ref_src), rel_err(out_cls, ref_cls)
        assert e_src < 5e-2, f"out_src mismatch (rel err {e_src})"
        assert e_cls < 5e-2, f"out_cls mismatch (rel err {e_cls})"

    print("KERNEL_OK")
</pallas_src>

<mosaic_0001>
module attributes {stable_mosaic.version = 11 : i64} {
  func.func @kernel(%arg0: i32, %arg1: memref<1x128x48xbf16, #tpu.memory_space<vmem>>, %arg2: memref<48x8xbf16, #tpu.memory_space<vmem>>, %arg3: memref<1x8xf32, #tpu.memory_space<vmem>>, %arg4: memref<256x64xbf16, #tpu.memory_space<vmem>>, %arg5: memref<128x16xbf16, #tpu.memory_space<vmem>>, %arg6: memref<1x16xf32, #tpu.memory_space<vmem>>, %arg7: memref<32x9xbf16, #tpu.memory_space<vmem>>, %arg8: memref<144x128xbf16, #tpu.memory_space<vmem>>, %arg9: memref<256x128xbf16, #tpu.memory_space<vmem>>, %arg10: memref<1x32x128xf32, #tpu.memory_space<vmem>>, %arg11: memref<1x2x128xf32, #tpu.memory_space<vmem>>) attributes {dimension_semantics = [#tpu.dimension_semantics<parallel>], iteration_bounds = array<i64: 2>, scalar_prefetch = 0 : i64, scratch_operands = 0 : i64, tpu.core_type = #tpu.core_type<tc>, window_params = [{transform_indices = @transform_0, window_bounds = array<i64: 1, 128, 48>}, {pipeline_mode = #tpu.pipeline_mode<synchronous>, transform_indices = @transform_1, window_bounds = array<i64: 48, 8>}, {pipeline_mode = #tpu.pipeline_mode<synchronous>, transform_indices = @transform_2, window_bounds = array<i64: 1, 8>}, {pipeline_mode = #tpu.pipeline_mode<synchronous>, transform_indices = @transform_3, window_bounds = array<i64: 256, 64>}, {pipeline_mode = #tpu.pipeline_mode<synchronous>, transform_indices = @transform_4, window_bounds = array<i64: 128, 16>}, {pipeline_mode = #tpu.pipeline_mode<synchronous>, transform_indices = @transform_5, window_bounds = array<i64: 1, 16>}, {pipeline_mode = #tpu.pipeline_mode<synchronous>, transform_indices = @transform_6, window_bounds = array<i64: 32, 9>}, {pipeline_mode = #tpu.pipeline_mode<synchronous>, transform_indices = @transform_7, window_bounds = array<i64: 144, 128>}, {pipeline_mode = #tpu.pipeline_mode<synchronous>, transform_indices = @transform_8, window_bounds = array<i64: 256, 128>}, {transform_indices = @transform_9, window_bounds = array<i64: 1, 32, 128>}, {transform_indices = @transform_10, window_bounds = array<i64: 1, 2, 128>}]} {
    %c0 = arith.constant 0 : index
    %c0_0 = arith.constant 0 : index
    %c0_1 = arith.constant 0 : index
    %0 = vector.load %arg1[%c0, %c0_0, %c0_1] : memref<1x128x48xbf16, #tpu.memory_space<vmem>>, vector<1x128x48xbf16>
    %1 = vector.shape_cast %0 : vector<1x128x48xbf16> to vector<128x48xbf16>
    %c0_2 = arith.constant 0 : index
    %c0_3 = arith.constant 0 : index
    %2 = vector.load %arg2[%c0_2, %c0_3] : memref<48x8xbf16, #tpu.memory_space<vmem>>, vector<48x8xbf16>
    %cst = arith.constant dense<0.000000e+00> : vector<128x8xf32>
    %3 = tpu.matmul %1, %2, %cst {dimension_numbers = #tpu.dot_dimension_numbers<[1], [0], [0], [1], [0, 0, 1, 1], [], []>} : vector<128x48xbf16>, vector<48x8xbf16>, vector<128x8xf32> -> vector<128x8xf32>
    %c0_4 = arith.constant 0 : index
    %c0_5 = arith.constant 0 : index
    %4 = vector.load %arg3[%c0_4, %c0_5] : memref<1x8xf32, #tpu.memory_space<vmem>>, vector<1x8xf32>
    %5 = vector.broadcast %4 : vector<1x8xf32> to vector<128x8xf32>
    %6 = arith.addf %3, %5 : vector<128x8xf32>
    %cst_6 = arith.constant 0.000000e+00 : f32
    %7 = vector.broadcast %cst_6 : f32 to vector<128x8xf32>
    %8 = arith.cmpf oge, %6, %7 : vector<128x8xf32>
    %cst_7 = arith.constant 0.00999999977 : f32
    %9 = vector.broadcast %cst_7 : f32 to vector<128x8xf32>
    %10 = arith.mulf %6, %9 : vector<128x8xf32>
    %11 = arith.select %8, %6, %10 : vector<128x8xi1>, vector<128x8xf32>
    %12 = arith.truncf %11 : vector<128x8xf32> to vector<128x8xbf16>
    %13 = vector.shape_cast %12 : vector<128x8xbf16> to vector<2x64x8xbf16>
    %c0_8 = arith.constant 0 : index
    %c0_9 = arith.constant 0 : index
    %14 = vector.load %arg4[%c0_8, %c0_9] : memref<256x64xbf16, #tpu.memory_space<vmem>>, vector<256x64xbf16>
    %15 = vector.shape_cast %14 : vector<256x64xbf16> to vector<1x256x64xbf16>
    %16 = vector.broadcast %15 : vector<1x256x64xbf16> to vector<2x256x64xbf16>
    "tpu.trace_start"() <{level = 10 : i32, message = "bom,bmc->boc"}> : () -> ()
    %cst_10 = arith.constant dense<0.000000e+00> : vector<2x256x8xf32>
    %17 = tpu.matmul %16, %13, %cst_10 {dimension_numbers = #tpu.dot_dimension_numbers<[2], [1], [1], [2], [0, 0, 0, 1, 1, 2], [0], [0]>} : vector<2x256x64xbf16>, vector<2x64x8xbf16>, vector<2x256x8xf32> -> vector<2x256x8xf32>
    "tpu.trace_stop"() : () -> ()
    %18 = arith.truncf %17 : vector<2x256x8xf32> to vector<2x256x8xbf16>
    %19 = vector.extract_strided_slice %18 {offsets = [0, 0, 0], sizes = [2, 16, 8], strides = [1, 1, 1]} : vector<2x256x8xbf16> to vector<2x16x8xbf16>
    %20 = vector.extract_strided_slice %18 {offsets = [0, 16, 0], sizes = [2, 16, 8], strides = [1, 1, 1]} : vector<2x256x8xbf16> to vector<2x16x8xbf16>
    %21 = vector.extract_strided_slice %18 {offsets = [0, 32, 0], sizes = [2, 16, 8], strides = [1, 1, 1]} : vector<2x256x8xbf16> to vector<2x16x8xbf16>
    %22 = vector.extract_strided_slice %18 {offsets = [0, 48, 0], sizes = [2, 16, 8], strides = [1, 1, 1]} : vector<2x256x8xbf16> to vector<2x16x8xbf16>
    %23 = vector.extract_strided_slice %18 {offsets = [0, 64, 0], sizes = [2, 16, 8], strides = [1, 1, 1]} : vector<2x256x8xbf16> to vector<2x16x8xbf16>
    %24 = vector.extract_strided_slice %18 {offsets = [0, 80, 0], sizes = [2, 16, 8], strides = [1, 1, 1]} : vector<2x256x8xbf16> to vector<2x16x8xbf16>
    %25 = vector.extract_strided_slice %18 {offsets = [0, 96, 0], sizes = [2, 16, 8], strides = [1, 1, 1]} : vector<2x256x8xbf16> to vector<2x16x8xbf16>
    %26 = vector.extract_strided_slice %18 {offsets = [0, 112, 0], sizes = [2, 16, 8], strides = [1, 1, 1]} : vector<2x256x8xbf16> to vector<2x16x8xbf16>
    %27 = vector.extract_strided_slice %18 {offsets = [0, 128, 0], sizes = [2, 16, 8], strides = [1, 1, 1]} : vector<2x256x8xbf16> to vector<2x16x8xbf16>
    %28 = vector.extract_strided_slice %18 {offsets = [0, 144, 0], sizes = [2, 16, 8], strides = [1, 1, 1]} : vector<2x256x8xbf16> to vector<2x16x8xbf16>
    %29 = vector.extract_strided_slice %18 {offsets = [0, 160, 0], sizes = [2, 16, 8], strides = [1, 1, 1]} : vector<2x256x8xbf16> to vector<2x16x8xbf16>
    %30 = vector.extract_strided_slice %18 {offsets = [0, 176, 0], sizes = [2, 16, 8], strides = [1, 1, 1]} : vector<2x256x8xbf16> to vector<2x16x8xbf16>
    %31 = vector.extract_strided_slice %18 {offsets = [0, 192, 0], sizes = [2, 16, 8], strides = [1, 1, 1]} : vector<2x256x8xbf16> to vector<2x16x8xbf16>
    %32 = vector.extract_strided_slice %18 {offsets = [0, 208, 0], sizes = [2, 16, 8], strides = [1, 1, 1]} : vector<2x256x8xbf16> to vector<2x16x8xbf16>
    %33 = vector.extract_strided_slice %18 {offsets = [0, 224, 0], sizes = [2, 16, 8], strides = [1, 1, 1]} : vector<2x256x8xbf16> to vector<2x16x8xbf16>
    %34 = vector.extract_strided_slice %18 {offsets = [0, 240, 0], sizes = [2, 16, 8], strides = [1, 1, 1]} : vector<2x256x8xbf16> to vector<2x16x8xbf16>
    %35 = tpu.concatenate %19, %20, %21, %22, %23, %24, %25, %26, %27, %28, %29, %30, %31, %32, %33, %34 in 2 : vector<2x16x8xbf16>, vector<2x16x8xbf16>, vector<2x16x8xbf16>, vector<2x16x8xbf16>, vector<2x16x8xbf16>, vector<2x16x8xbf16>, vector<2x16x8xbf16>, vector<2x16x8xbf16>, vector<2x16x8xbf16>, vector<2x16x8xbf16>, vector<2x16x8xbf16>, vector<2x16x8xbf16>, vector<2x16x8xbf16>, vector<2x16x8xbf16>, vector<2x16x8xbf16>, vector<2x16x8xbf16> -> vector<2x16x128xbf16>
    %36 = vector.shape_cast %35 : vector<2x16x128xbf16> to vector<32x128xbf16>
    %c0_11 = arith.constant 0 : index
    %c0_12 = arith.constant 0 : index
    %37 = vector.load %arg5[%c0_11, %c0_12] : memref<128x16xbf16, #tpu.memory_space<vmem>>, vector<128x16xbf16>
    %cst_13 = arith.constant dense<0.000000e+00> : vector<32x16xf32>
    %38 = tpu.matmul %36, %37, %cst_13 {dimension_numbers = #tpu.dot_dimension_numbers<[1], [0], [0], [1], [0, 0, 1, 1], [], []>} : vector<32x128xbf16>, vector<128x16xbf16>, vector<32x16xf32> -> vector<32x16xf32>
    %c0_14 = arith.constant 0 : index
    %c0_15 = arith.constant 0 : index
    %39 = vector.load %arg6[%c0_14, %c0_15] : memref<1x16xf32, #tpu.memory_space<vmem>>, vector<1x16xf32>
    %40 = vector.broadcast %39 : vector<1x16xf32> to vector<32x16xf32>
    %41 = arith.addf %38, %40 : vector<32x16xf32>
    %cst_16 = arith.constant 0.000000e+00 : f32
    %42 = vector.broadcast %cst_16 : f32 to vector<32x16xf32>
    %43 = arith.cmpf oge, %41, %42 : vector<32x16xf32>
    %cst_17 = arith.constant 0.00999999977 : f32
    %44 = vector.broadcast %cst_17 : f32 to vector<32x16xf32>
    %45 = arith.mulf %41, %44 : vector<32x16xf32>
    %46 = arith.select %43, %41, %45 : vector<32x16xi1>, vector<32x16xf32>
    %47 = arith.truncf %46 : vector<32x16xf32> to vector<32x16xbf16>
    %cst_18 = arith.constant 0.000000e+00 : bf16
    %48 = vector.broadcast %cst_18 : bf16 to vector<8x16xbf16>
    %49 = tpu.concatenate %48, %47, %48 in 0 : vector<8x16xbf16>, vector<32x16xbf16>, vector<8x16xbf16> -> vector<48x16xbf16>
    %50 = vector.extract_strided_slice %49 {offsets = [3, 0], sizes = [32, 16], strides = [1, 1]} : vector<48x16xbf16> to vector<32x16xbf16>
    %c0_19 = arith.constant 0 : index
    %c0_20 = arith.constant 0 : index
    %51 = vector.load %arg7[%c0_19, %c0_20] : memref<32x9xbf16, #tpu.memory_space<vmem>>, vector<32x1xbf16>
    %52 = vector.broadcast %51 : vector<32x1xbf16> to vector<32x16xbf16>
    %53 = arith.mulf %50, %52 : vector<32x16xbf16>
    %54 = vector.extract_strided_slice %49 {offsets = [4, 0], sizes = [32, 16], strides = [1, 1]} : vector<48x16xbf16> to vector<32x16xbf16>
    %c0_21 = arith.constant 0 : index
    %c1 = arith.constant 1 : index
    %55 = vector.load %arg7[%c0_21, %c1] : memref<32x9xbf16, #tpu.memory_space<vmem>>, vector<32x1xbf16>
    %56 = vector.broadcast %55 : vector<32x1xbf16> to vector<32x16xbf16>
    %57 = arith.mulf %54, %56 : vector<32x16xbf16>
    %58 = vector.extract_strided_slice %49 {offsets = [5, 0], sizes = [32, 16], strides = [1, 1]} : vector<48x16xbf16> to vector<32x16xbf16>
    %c0_22 = arith.constant 0 : index
    %c2 = arith.constant 2 : index
    %59 = vector.load %arg7[%c0_22, %c2] : memref<32x9xbf16, #tpu.memory_space<vmem>>, vector<32x1xbf16>
    %60 = vector.broadcast %59 : vector<32x1xbf16> to vector<32x16xbf16>
    %61 = arith.mulf %58, %60 : vector<32x16xbf16>
    %62 = vector.extract_strided_slice %49 {offsets = [7, 0], sizes = [32, 16], strides = [1, 1]} : vector<48x16xbf16> to vector<32x16xbf16>
    %c0_23 = arith.constant 0 : index
    %c3 = arith.constant 3 : index
    %63 = vector.load %arg7[%c0_23, %c3] : memref<32x9xbf16, #tpu.memory_space<vmem>>, vector<32x1xbf16>
    %64 = vector.broadcast %63 : vector<32x1xbf16> to vector<32x16xbf16>
    %65 = arith.mulf %62, %64 : vector<32x16xbf16>
    %66 = vector.extract_strided_slice %49 {offsets = [8, 0], sizes = [32, 16], strides = [1, 1]} : vector<48x16xbf16> to vector<32x16xbf16>
    %c0_24 = arith.constant 0 : index
    %c4 = arith.constant 4 : index
    %67 = vector.load %arg7[%c0_24, %c4] : memref<32x9xbf16, #tpu.memory_space<vmem>>, vector<32x1xbf16>
    %68 = vector.broadcast %67 : vector<32x1xbf16> to vector<32x16xbf16>
    %69 = arith.mulf %66, %68 : vector<32x16xbf16>
    %70 = vector.extract_strided_slice %49 {offsets = [9, 0], sizes = [32, 16], strides = [1, 1]} : vector<48x16xbf16> to vector<32x16xbf16>
    %c0_25 = arith.constant 0 : index
    %c5 = arith.constant 5 : index
    %71 = vector.load %arg7[%c0_25, %c5] : memref<32x9xbf16, #tpu.memory_space<vmem>>, vector<32x1xbf16>
    %72 = vector.broadcast %71 : vector<32x1xbf16> to vector<32x16xbf16>
    %73 = arith.mulf %70, %72 : vector<32x16xbf16>
    %74 = vector.extract_strided_slice %49 {offsets = [11, 0], sizes = [32, 16], strides = [1, 1]} : vector<48x16xbf16> to vector<32x16xbf16>
    %c0_26 = arith.constant 0 : index
    %c6 = arith.constant 6 : index
    %75 = vector.load %arg7[%c0_26, %c6] : memref<32x9xbf16, #tpu.memory_space<vmem>>, vector<32x1xbf16>
    %76 = vector.broadcast %75 : vector<32x1xbf16> to vector<32x16xbf16>
    %77 = arith.mulf %74, %76 : vector<32x16xbf16>
    %78 = vector.extract_strided_slice %49 {offsets = [12, 0], sizes = [32, 16], strides = [1, 1]} : vector<48x16xbf16> to vector<32x16xbf16>
    %c0_27 = arith.constant 0 : index
    %c7 = arith.constant 7 : index
    %79 = vector.load %arg7[%c0_27, %c7] : memref<32x9xbf16, #tpu.memory_space<vmem>>, vector<32x1xbf16>
    %80 = vector.broadcast %79 : vector<32x1xbf16> to vector<32x16xbf16>
    %81 = arith.mulf %78, %80 : vector<32x16xbf16>
    %82 = vector.extract_strided_slice %49 {offsets = [13, 0], sizes = [32, 16], strides = [1, 1]} : vector<48x16xbf16> to vector<32x16xbf16>
    %c0_28 = arith.constant 0 : index
    %c8 = arith.constant 8 : index
    %83 = vector.load %arg7[%c0_28, %c8] : memref<32x9xbf16, #tpu.memory_space<vmem>>, vector<32x1xbf16>
    %84 = vector.broadcast %83 : vector<32x1xbf16> to vector<32x16xbf16>
    %85 = arith.mulf %82, %84 : vector<32x16xbf16>
    %86 = tpu.concatenate %53, %57, %61, %65, %69, %73, %77, %81, %85 in 1 : vector<32x16xbf16>, vector<32x16xbf16>, vector<32x16xbf16>, vector<32x16xbf16>, vector<32x16xbf16>, vector<32x16xbf16>, vector<32x16xbf16>, vector<32x16xbf16>, vector<32x16xbf16> -> vector<32x144xbf16>
    %c0_29 = arith.constant 0 : index
    %c0_30 = arith.constant 0 : index
    %87 = vector.load %arg8[%c0_29, %c0_30] : memref<144x128xbf16, #tpu.memory_space<vmem>>, vector<144x128xbf16>
    %cst_31 = arith.constant dense<0.000000e+00> : vector<32x128xf32>
    %88 = tpu.matmul %86, %87, %cst_31 {dimension_numbers = #tpu.dot_dimension_numbers<[1], [0], [0], [1], [0, 0, 1, 1], [], []>} : vector<32x144xbf16>, vector<144x128xbf16>, vector<32x128xf32> -> vector<32x128xf32>
    %c0_32 = arith.constant 0 : index
    %c0_33 = arith.constant 0 : index
    %c0_34 = arith.constant 0 : index
    %89 = vector.load %arg10[%c0_32, %c0_33, %c0_34] : memref<1x32x128xf32, #tpu.memory_space<vmem>>, vector<1x32x128xf32>
    %90 = vector.shape_cast %89 : vector<1x32x128xf32> to vector<32x128xf32>
    %91 = vector.shape_cast %88 : vector<32x128xf32> to vector<1x32x128xf32>
    tpu.vector_store %arg10[%c0_32, %c0_33, %c0_34], %91 {strides = array<i32>} : memref<1x32x128xf32, #tpu.memory_space<vmem>>, vector<1x32x128xf32>,
    %92 = vector.extract_strided_slice %47 {offsets = [0, 0], sizes = [1, 16], strides = [1, 1]} : vector<32x16xbf16> to vector<1x16xbf16>
    %93 = vector.extract_strided_slice %47 {offsets = [1, 0], sizes = [1, 16], strides = [1, 1]} : vector<32x16xbf16> to vector<1x16xbf16>
    %94 = vector.extract_strided_slice %47 {offsets = [2, 0], sizes = [1, 16], strides = [1, 1]} : vector<32x16xbf16> to vector<1x16xbf16>
    %95 = vector.extract_strided_slice %47 {offsets = [3, 0], sizes = [1, 16], strides = [1, 1]} : vector<32x16xbf16> to vector<1x16xbf16>
    %96 = vector.extract_strided_slice %47 {offsets = [4, 0], sizes = [1, 16], strides = [1, 1]} : vector<32x16xbf16> to vector<1x16xbf16>
    %97 = vector.extract_strided_slice %47 {offsets = [5, 0], sizes = [1, 16], strides = [1, 1]} : vector<32x16xbf16> to vector<1x16xbf16>
    %98 = vector.extract_strided_slice %47 {offsets = [6, 0], sizes = [1, 16], strides = [1, 1]} : vector<32x16xbf16> to vector<1x16xbf16>
    %99 = vector.extract_strided_slice %47 {offsets = [7, 0], sizes = [1, 16], strides = [1, 1]} : vector<32x16xbf16> to vector<1x16xbf16>
    %100 = vector.extract_strided_slice %47 {offsets = [8, 0], sizes = [1, 16], strides = [1, 1]} : vector<32x16xbf16> to vector<1x16xbf16>
    %101 = vector.extract_strided_slice %47 {offsets = [9, 0], sizes = [1, 16], strides = [1, 1]} : vector<32x16xbf16> to vector<1x16xbf16>
    %102 = vector.extract_strided_slice %47 {offsets = [10, 0], sizes = [1, 16], strides = [1, 1]} : vector<32x16xbf16> to vector<1x16xbf16>
    %103 = vector.extract_strided_slice %47 {offsets = [11, 0], sizes = [1, 16], strides = [1, 1]} : vector<32x16xbf16> to vector<1x16xbf16>
    %104 = vector.extract_strided_slice %47 {offsets = [12, 0], sizes = [1, 16], strides = [1, 1]} : vector<32x16xbf16> to vector<1x16xbf16>
    %105 = vector.extract_strided_slice %47 {offsets = [13, 0], sizes = [1, 16], strides = [1, 1]} : vector<32x16xbf16> to vector<1x16xbf16>
    %106 = vector.extract_strided_slice %47 {offsets = [14, 0], sizes = [1, 16], strides = [1, 1]} : vector<32x16xbf16> to vector<1x16xbf16>
    %107 = vector.extract_strided_slice %47 {offsets = [15, 0], sizes = [1, 16], strides = [1, 1]} : vector<32x16xbf16> to vector<1x16xbf16>
    %108 = tpu.concatenate %92, %93, %94, %95, %96, %97, %98, %99, %100, %101, %102, %103, %104, %105, %106, %107 in 1 : vector<1x16xbf16>, vector<1x16xbf16>, vector<1x16xbf16>, vector<1x16xbf16>, vector<1x16xbf16>, vector<1x16xbf16>, vector<1x16xbf16>, vector<1x16xbf16>, vector<1x16xbf16>, vector<1x16xbf16>, vector<1x16xbf16>, vector<1x16xbf16>, vector<1x16xbf16>, vector<1x16xbf16>, vector<1x16xbf16>, vector<1x16xbf16> -> vector<1x256xbf16>
    %109 = vector.extract_strided_slice %47 {offsets = [16, 0], sizes = [1, 16], strides = [1, 1]} : vector<32x16xbf16> to vector<1x16xbf16>
    %110 = vector.extract_strided_slice %47 {offsets = [17, 0], sizes = [1, 16], strides = [1, 1]} : vector<32x16xbf16> to vector<1x16xbf16>
    %111 = vector.extract_strided_slice %47 {offsets = [18, 0], sizes = [1, 16], strides = [1, 1]} : vector<32x16xbf16> to vector<1x16xbf16>
    %112 = vector.extract_strided_slice %47 {offsets = [19, 0], sizes = [1, 16], strides = [1, 1]} : vector<32x16xbf16> to vector<1x16xbf16>
    %113 = vector.extract_strided_slice %47 {offsets = [20, 0], sizes = [1, 16], strides = [1, 1]} : vector<32x16xbf16> to vector<1x16xbf16>
    %114 = vector.extract_strided_slice %47 {offsets = [21, 0], sizes = [1, 16], strides = [1, 1]} : vector<32x16xbf16> to vector<1x16xbf16>
    %115 = vector.extract_strided_slice %47 {offsets = [22, 0], sizes = [1, 16], strides = [1, 1]} : vector<32x16xbf16> to vector<1x16xbf16>
    %116 = vector.extract_strided_slice %47 {offsets = [23, 0], sizes = [1, 16], strides = [1, 1]} : vector<32x16xbf16> to vector<1x16xbf16>
    %117 = vector.extract_strided_slice %47 {offsets = [24, 0], sizes = [1, 16], strides = [1, 1]} : vector<32x16xbf16> to vector<1x16xbf16>
    %118 = vector.extract_strided_slice %47 {offsets = [25, 0], sizes = [1, 16], strides = [1, 1]} : vector<32x16xbf16> to vector<1x16xbf16>
    %119 = vector.extract_strided_slice %47 {offsets = [26, 0], sizes = [1, 16], strides = [1, 1]} : vector<32x16xbf16> to vector<1x16xbf16>
    %120 = vector.extract_strided_slice %47 {offsets = [27, 0], sizes = [1, 16], strides = [1, 1]} : vector<32x16xbf16> to vector<1x16xbf16>
    %121 = vector.extract_strided_slice %47 {offsets = [28, 0], sizes = [1, 16], strides = [1, 1]} : vector<32x16xbf16> to vector<1x16xbf16>
    %122 = vector.extract_strided_slice %47 {offsets = [29, 0], sizes = [1, 16], strides = [1, 1]} : vector<32x16xbf16> to vector<1x16xbf16>
    %123 = vector.extract_strided_slice %47 {offsets = [30, 0], sizes = [1, 16], strides = [1, 1]} : vector<32x16xbf16> to vector<1x16xbf16>
    %124 = vector.extract_strided_slice %47 {offsets = [31, 0], sizes = [1, 16], strides = [1, 1]} : vector<32x16xbf16> to vector<1x16xbf16>
    %125 = tpu.concatenate %109, %110, %111, %112, %113, %114, %115, %116, %117, %118, %119, %120, %121, %122, %123, %124 in 1 : vector<1x16xbf16>, vector<1x16xbf16>, vector<1x16xbf16>, vector<1x16xbf16>, vector<1x16xbf16>, vector<1x16xbf16>, vector<1x16xbf16>, vector<1x16xbf16>, vector<1x16xbf16>, vector<1x16xbf16>, vector<1x16xbf16>, vector<1x16xbf16>, vector<1x16xbf16>, vector<1x16xbf16>, vector<1x16xbf16>, vector<1x16xbf16> -> vector<1x256xbf16>
    %126 = tpu.concatenate %108, %125 in 0 : vector<1x256xbf16>, vector<1x256xbf16> -> vector<2x256xbf16>
    %c0_35 = arith.constant 0 : index
    %c0_36 = arith.constant 0 : index
    %127 = vector.load %arg9[%c0_35, %c0_36] : memref<256x128xbf16, #tpu.memory_space<vmem>>, vector<256x128xbf16>
    %cst_37 = arith.constant dense<0.000000e+00> : vector<2x128xf32>
    %128 = tpu.matmul %126, %127, %cst_37 {dimension_numbers = #tpu.dot_dimension_numbers<[1], [0], [0], [1], [0, 0, 1, 1], [], []>} : vector<2x256xbf16>, vector<256x128xbf16>, vector<2x128xf32> -> vector<2x128xf32>
    %c0_38 = arith.constant 0 : index
    %c0_39 = arith.constant 0 : index
    %c0_40 = arith.constant 0 : index
    %129 = vector.load %arg11[%c0_38, %c0_39, %c0_40] : memref<1x2x128xf32, #tpu.memory_space<vmem>>, vector<1x2x128xf32>
    %130 = vector.shape_cast %129 : vector<1x2x128xf32> to vector<2x128xf32>
    %131 = vector.shape_cast %128 : vector<2x128xf32> to vector<1x2x128xf32>
    tpu.vector_store %arg11[%c0_38, %c0_39, %c0_40], %131 {strides = array<i32>} : memref<1x2x128xf32, #tpu.memory_space<vmem>>, vector<1x2x128xf32>,
    return
  }
  func.func @transform_0(%arg0: i32) -> (i32, i32, i32) {
    %c0_i32 = arith.constant 0 : i32
    %c0_i32_0 = arith.constant 0 : i32
    %c0_i32_1 = arith.constant 0 : i32
    return %arg0, %c0_i32, %c0_i32_0 : i32, i32, i32
  }
  func.func @transform_1(%arg0: i32) -> (i32, i32) {
    %c0_i32 = arith.constant 0 : i32
    %c0_i32_0 = arith.constant 0 : i32
    %c0_i32_1 = arith.constant 0 : i32
    return %c0_i32, %c0_i32_0 : i32, i32
  }
  func.func @transform_2(%arg0: i32) -> (i32, i32) {
    %c0_i32 = arith.constant 0 : i32
    %c0_i32_0 = arith.constant 0 : i32
    %c0_i32_1 = arith.constant 0 : i32
    return %c0_i32, %c0_i32_0 : i32, i32
  }
  func.func @transform_3(%arg0: i32) -> (i32, i32) {
    %c0_i32 = arith.constant 0 : i32
    %c0_i32_0 = arith.constant 0 : i32
    %c0_i32_1 = arith.constant 0 : i32
    return %c0_i32, %c0_i32_0 : i32, i32
  }
  func.func @transform_4(%arg0: i32) -> (i32, i32) {
    %c0_i32 = arith.constant 0 : i32
    %c0_i32_0 = arith.constant 0 : i32
    %c0_i32_1 = arith.constant 0 : i32
    return %c0_i32, %c0_i32_0 : i32, i32
  }
  func.func @transform_5(%arg0: i32) -> (i32, i32) {
    %c0_i32 = arith.constant 0 : i32
    %c0_i32_0 = arith.constant 0 : i32
    %c0_i32_1 = arith.constant 0 : i32
    return %c0_i32, %c0_i32_0 : i32, i32
  }
  func.func @transform_6(%arg0: i32) -> (i32, i32) {
    %c0_i32 = arith.constant 0 : i32
    %c0_i32_0 = arith.constant 0 : i32
    %c0_i32_1 = arith.constant 0 : i32
    return %c0_i32, %c0_i32_0 : i32, i32
  }
  func.func @transform_7(%arg0: i32) -> (i32, i32) {
    %c0_i32 = arith.constant 0 : i32
    %c0_i32_0 = arith.constant 0 : i32
    %c0_i32_1 = arith.constant 0 : i32
    return %c0_i32, %c0_i32_0 : i32, i32
  }
  func.func @transform_8(%arg0: i32) -> (i32, i32) {
    %c0_i32 = arith.constant 0 : i32
    %c0_i32_0 = arith.constant 0 : i32
    %c0_i32_1 = arith.constant 0 : i32
    return %c0_i32, %c0_i32_0 : i32, i32
  }
  func.func @transform_9(%arg0: i32) -> (i32, i32, i32) {
    %c0_i32 = arith.constant 0 : i32
    %c0_i32_0 = arith.constant 0 : i32
    %c0_i32_1 = arith.constant 0 : i32
    return %arg0, %c0_i32, %c0_i32_0 : i32, i32, i32
  }
  func.func @transform_10(%arg0: i32) -> (i32, i32, i32) {
    %c0_i32 = arith.constant 0 : i32
    %c0_i32_0 = arith.constant 0 : i32
    %c0_i32_1 = arith.constant 0 : i32
    return %arg0, %c0_i32, %c0_i32_0 : i32, i32, i32
  }
}

</mosaic_0001>

<bundles_post_ra>
// kernel: squeeze.1
= control target key start
LH: loop header
LB: loop body
LE: loop exit
PB: predicated region body
PF: predicated region fallthrough
CT: control target
= control target key end

     0   :  { %s227_s0 = inlined_call_operand.vmem [shape: f32[64], index: 0, kind: input, shape index: {}]   ;;  %s228_s1 = inlined_call_operand.hbm [shape: f32[4,1,4,4], index: 1, kind: output, shape index: {}]  }
   0x1   :  { %v6_v0 = vld [vmem:[%s227_s0] sm:$0x1] }
   0x2   :  { %7 = vst [vmem:[#allocation3] sm:$0x1] %v6_v0 }
   0x3   :  { %2 = vsyncpa [#allocation1], 0  ;;  %s179_s0 = smov 124   ;;  %s180_s8 = smov 116   ;;  %vm9_vm0 = vcmask 31744  }
   0x4   :  { %s181_s9 = smov 120   ;;  %s182_s10 = smov 112  }
   0x5   :  { %s183_s11 = smov 108   ;;  %s184_s12 = smov 104  }
   0x6   :  { %s185_s13 = smov 100   ;;  %s186_s14 = smov 96  }
   0x7   :  { %s187_s15 = smov 92   ;;  %s188_s16 = smov 88  }
   0x8   :  { %s189_s17 = smov 84   ;;  %s190_s18 = smov 80  }
   0x9   :  { %v11_v1 = vld [vmem:[#allocation3] sm:$0x1]   ;;  %s191_s19 = smov 76   ;;  %s192_s20 = smov 72  }
   0xa   :  { %v23_v2 = vld [vmem:[#allocation3] sm:$0x1]   ;;  %12 = vrot.lane.b32.xlu0 %v11_v1, %s179_s0  ;;  %s193_s21 = smov 68   ;;  %s194_s22 = smov [#allocation0]  }
   0xb   :  { %24 = vrot.lane.b32.xlu1 %v23_v2, %s180_s8  ;;  %v17_v3 = vld [vmem:[#allocation3] sm:$0x1]   ;;  %s133_s23 = sshll.u32 %s194_s22, 4  ;;  %s134_s23 = int_to_ptr.vmem [resolvable:$true] %s133_s23 }
   0xc   :  { %v29_v4 = vld [vmem:[#allocation3] sm:$0x1]   ;;  %s157_s24 = scalar_lea.vmem %s134_s23, 256  ;;  %p162_p1 = scmp.lt.s32.totalorder %s134_s23, %s134_s23 }
   0xd   :  { %v8_v5 = vld [vmem:[#allocation3] sm:$0x1]   ;;  %p158_p0 = scmp.ne.s32.totalorder %s134_s23, %s157_s24  ;;  %p163_p2 = scmp.lt.s32.totalorder %s157_s24, %s157_s24 }
   0xe   :  { %18 = vrot.lane.b32.xlu0 %v17_v3, %s181_s9  ;;  %v35_v6 = vld [vmem:[#allocation3] sm:$0x1]   ;;  %10 = vst.msk [vmem:[#allocation2] sm:$0x1] %vm9_vm0, %v8_v5  }
   0xf   :  { %30 = vrot.lane.b32.xlu1 %v29_v4, %s182_s10  ;;  %v41_v7 = vld [vmem:[#allocation3] sm:$0x1]   ;;  %p164_p3 = por %p163_p2, %p162_p1 }
  0x10   :  { %v47_v8 = vld [vmem:[#allocation3] sm:$0x1]  }
  0x11   :  { %v53_v9 = vld [vmem:[#allocation3] sm:$0x1]   ;;  %p165_p4 = pnand %p164_p3, %p158_p0 }
  0x12   :  { %36 = vrot.lane.b32.xlu0 %v35_v6, %s183_s11  ;;  %v59_v10 = vld [vmem:[#allocation3] sm:$0x1]  }
  0x13   :  { %42 = vrot.lane.b32.xlu1 %v41_v7, %s184_s12  ;;  %v65_v11 = vld [vmem:[#allocation3] sm:$0x1]  }
  0x14   :  { %v71_v12 = vld [vmem:[#allocation3] sm:$0x1]  }
  0x15   :  { %v77_v13 = vld [vmem:[#allocation3] sm:$0x1]  }
  0x16   :  { %48 = vrot.lane.b32.xlu0 %v47_v8, %s185_s13  ;;  %v83_v14 = vld [vmem:[#allocation3] sm:$0x1]  }
  0x17   :  { %54 = vrot.lane.b32.xlu1 %v53_v9, %s186_s14  ;;  %v89_v15 = vld [vmem:[#allocation3] sm:$0x1]  }
  0x18   :  { %v95_v16 = vld [vmem:[#allocation3] sm:$0x1]  }
  0x1a   :  { %60 = vrot.lane.b32.xlu0 %v59_v10, %s187_s15 }
  0x1b   :  { %66 = vrot.lane.b32.xlu1 %v65_v11, %s188_s16 }
  0x1e   :  { %72 = vrot.lane.b32.xlu0 %v71_v12, %s189_s17 }
  0x1f   :  { %78 = vrot.lane.b32.xlu1 %v77_v13, %s190_s18 }
  0x22   :  { %84 = vrot.lane.b32.xlu0 %v83_v14, %s191_s19 }
  0x23   :  { %90 = vrot.lane.b32.xlu1 %v89_v15, %s192_s20 }
  0x26   :  { %96 = vrot.lane.b32.xlu0 %v95_v16, %s193_s21 }
  0x7c   :  { %v13_v17 = vpop.permute.xlu0 %12  }
  0x7d   :  { %v25_v18 = vpop.permute.xlu1 %24   ;;  %16 = vst.msk [vmem:[#allocation2 + $0x1] sm:$0x1] %vm9_vm0, %v13_v17  }
  0x7e   :  { %28 = vst.msk [vmem:[#allocation2 + $0x3] sm:$0x1] %vm9_vm0, %v25_v18  }
  0x80   :  { %v19_v19 = vpop.permute.xlu0 %18  }
  0x81   :  { %v31_v20 = vpop.permute.xlu1 %30   ;;  %22 = vst.msk [vmem:[#allocation2 + $0x2] sm:$0x1] %vm9_vm0, %v19_v19  }
  0x82   :  { %34 = vst.msk [vmem:[#allocation2 + $0x8] sm:$0x1] %vm9_vm0, %v31_v20  }
  0x84   :  { %v37_v21 = vpop.permute.xlu0 %36  }
  0x85   :  { %v43_v22 = vpop.permute.xlu1 %42   ;;  %40 = vst.msk [vmem:[#allocation2 + $0x9] sm:$0x1] %vm9_vm0, %v37_v21  }
  0x86   :  { %46 = vst.msk [vmem:[#allocation2 + $0xa] sm:$0x1] %vm9_vm0, %v43_v22  }
  0x88   :  { %v49_v23 = vpop.permute.xlu0 %48   ;;  %v105_v25 = vld [vmem:[#allocation2] sm:$0xf] }
  0x89   :  { %v55_v24 = vpop.permute.xlu1 %54   ;;  %52 = vst.msk [vmem:[#allocation2 + $0xb] sm:$0x1] %vm9_vm0, %v49_v23   ;;  %108 = vst [vmem:[#allocation0] sm:$0xf] %v105_v25 }
  0x8a   :  { %58 = vst.msk [vmem:[#allocation2 + $0x10] sm:$0x1] %vm9_vm0, %v55_v24  }
  0x8c   :  { %v61_v26 = vpop.permute.xlu0 %60  }
  0x8d   :  { %v67_v27 = vpop.permute.xlu1 %66   ;;  %64 = vst.msk [vmem:[#allocation2 + $0x11] sm:$0x1] %vm9_vm0, %v61_v26  }
  0x8e   :  { %70 = vst.msk [vmem:[#allocation2 + $0x12] sm:$0x1] %vm9_vm0, %v67_v27  }
  0x90   :  { %v73_v28 = vpop.permute.xlu0 %72   ;;  %v110_v30 = vld [vmem:[#allocation2 + $0x8] sm:$0xf] }
  0x91   :  { %v79_v29 = vpop.permute.xlu1 %78   ;;  %76 = vst.msk [vmem:[#allocation2 + $0x13] sm:$0x1] %vm9_vm0, %v73_v28   ;;  %114 = vst [vmem:[#allocation0 + $0x4] sm:$0xf] %v110_v30 }
  0x92   :  { %82 = vst.msk [vmem:[#allocation2 + $0x18] sm:$0x1] %vm9_vm0, %v79_v29  }
  0x94   :  { %v85_v31 = vpop.permute.xlu0 %84  }
  0x95   :  { %v91_v32 = vpop.permute.xlu1 %90   ;;  %88 = vst.msk [vmem:[#allocation2 + $0x19] sm:$0x1] %vm9_vm0, %v85_v31  }
  0x96   :  { %94 = vst.msk [vmem:[#allocation2 + $0x1a] sm:$0x1] %vm9_vm0, %v91_v32  }
  0x98   :  { %v97_v33 = vpop.permute.xlu0 %96   ;;  %v116_v34 = vld [vmem:[#allocation2 + $0x10] sm:$0xf] }
  0x99   :  { %100 = vst.msk [vmem:[#allocation2 + $0x1b] sm:$0x1] %vm9_vm0, %v97_v33   ;;  %121 = vst [vmem:[#allocation0 + $0x8] sm:$0xf] %v116_v34 }
  0xa0   :  { %v123_v35 = vld [vmem:[#allocation2 + $0x18] sm:$0xf] }
  0xa1   :  { %128 = vst [vmem:[#allocation0 + $0xc] sm:$0xf] %v123_v35 }
  0xa2   :  { %168 = shalt.err (!%p165_p4)
}
  0xa3   :  { %136 = dma.vmem_to_hbm [thread:$0]  %s134_s23, 256, %s228_s1, [#allocation1]  }
  0xa4   :  { %177 = dma.done.wait [#allocation1], 256  }
  0xa5   :  { %178 = vsyncadd [#allocation1], 4294967040 }
  0xa6   :  { %138 = vsyncpa [#allocation1], 1 }

// kernel: discriminator_forward.1
= control target key start
LH: loop header
LB: loop body
LE: loop exit
PB: predicated region body
PF: predicated region fallthrough
CT: control target
= control target key end

     0   :  { %s4538_s0 = inlined_call_operand.vmem [shape: bf16[2,128,48], index: 0, kind: input, shape index: {}]   ;;  %s4539_s1 = inlined_call_operand.vmem [shape: bf16[48,8], index: 1, kind: input, shape index: {}]   ;;  %s4540_s2 = inlined_call_operand.vmem [shape: f32[1,8], index: 2, kind: input, shape index: {}]   ;;  %s4541_s3 = inlined_call_operand.vmem [shape: bf16[256,64], index: 3, kind: input, shape index: {}]   ;;  %s4542_s4 = inlined_call_operand.vmem [shape: bf16[128,16], index: 4, kind: input, shape index: {}]   ;;  %s4543_s5 = inlined_call_operand.vmem [shape: f32[1,16], index: 5, kind: input, shape index: {}]   ;;  %s4544_s6 = inlined_call_operand.vmem [shape: bf16[32,9], index: 6, kind: input, shape index: {}]   ;;  %s4545_s7 = inlined_call_operand.vmem [shape: bf16[144,128], index: 7, kind: input, shape index: {}]   ;;  %s4546_s8 = inlined_call_operand.vmem [shape: bf16[256,128], index: 8, kind: input, shape index: {}]   ;;  %s4547_s9 = inlined_call_operand.vmem [shape: f32[2,32,128], index: 9, kind: output, shape index: {0}]   ;;  %s4548_s10 = inlined_call_operand.hbm [shape: f32[2,2,128], index: 10, kind: output, shape index: {1}]  }
   0x1   :  { %4561 = sst [smem:[#allocation5_spill]] %s4538_s0 }
   0x2   :  { %4562 = sst [smem:[#allocation6_spill]] %s4539_s1 }
   0x3   :  { %4563 = sst [smem:[#allocation7_spill]] %s4540_s2 }
   0x4   :  { %16 = vsyncpa [#allocation3], 0 }
   0x5   :  { %18 = vsyncpa [#allocation3 + $0x1], 0  ;;  %s3581_s13 = smov 0   ;;  %s3583_s14 = smov 0  }
   0x6   :  { %s3585_s15 = smov 0   ;;  %s3587_s16 = smov 0  }
   0x7 LB: > { %s3602_s17 = sadd.s32 4294967295, %s3498_s16   ;;  %s2953_s18 = sadd.s32 4294967294, %s3498_s16   ;;  %s3498_s16 = sphi %s3587_s16, %s4580_s16   ;;  %s3494_s15 = sphi %s3585_s15, %s4579_s15   ;;  %s3490_s14 = sphi %s3583_s14, %s4578_s14   ;;  %s3486_s13 = sphi %s3581_s13, %s4577_s13  }
   0x8   : > { %s3606_s19 = sadd.s32 1, %s3498_s16   ;;  %s251_s20 = sadd.s32 1, %s3494_s15 }
   0x9   : > { %s248_s21 = ssub.s32 %s3498_s16, %s3606_s19  ;;  %p261_p0 = scmp.ne.s32.totalorder %s3494_s15, %s3490_s14 }
   0xa   : > { %p249_p1 = scmp.eq.s32.totalorder %s248_s21, 0  ;;  %p262_p2 = scmp.eq.s32.totalorder %s3602_s17, 1 }
   0xb   : > { %p267_p3 = scmp.ne.s32.totalorder %s3490_s14, %s3486_s13  ;;  %p268_p4 = scmp.eq.s32.totalorder %s2953_s18, 1 }
   0xc   : > { %s3617_s22 = scalar_select %p249_p1, %s3494_s15, %s251_s20  }
   0xd   : > { %p3619_p5 = por %p262_p2, %p261_p0  ;;  %p3623_p6 = por %p268_p4, %p267_p3 }
   0xe   : > { %p2956_p7 = scmp.ge.s32.totalorder %s3498_s16, 1  ;;  %p318_p8 = scmp.lt.s32.totalorder %s3498_s16, 3 }
  0x10   : > { %p319_p9 = pnand %p2956_p7, %p318_p8 }
  0x11   : > { %s4566_s1 = sld [smem:[#allocation6_spill]] (!%p319_p9)  ;;  %p361_p10 = scmp.lt.s32.totalorder (!%p319_p9), %s3602_s17, 1 }
  0x12   : > { %322 = sbr.rel (%p319_p9) target bundleno = 1287 (0x507), region = 56  ;;  %s4567_s0 = sld [smem:[#allocation5_spill]] (!%p319_p9) }
  0x13   : > { %s4568_s2 = sld [smem:[#allocation7_spill]] (!%p319_p9)  ;;  %s3500_s30 = smov (!%p319_p9), 8  }
  0x14   : > { %s3501_s11 = smov (!%p319_p9), 24   ;;  %s3504_s27 = smov (!%p319_p9), 32  }
  0x15   : > { %s3505_s28 = smov (!%p319_p9), 56   ;;  %s4549_s18 = smov (!%p319_p9), 48  }
  0x16   : > { %s3507_s20 = smov (!%p319_p9), 72   ;;  %s4551_s26 = smov (!%p319_p9), 64  }
  0x17   : > { %v3378_v0 = vld [vmem:[%s4566_s1 + $0x10] sm:$0xff]   ;;  %v3379_v1 = vld [vmem:[%s4566_s1 + $0x8] sm:$0xff]   ;;  %s3637_s29 = scalar_select %p361_p10, %s3602_s17, 1  ;;  %vm459_vm0 = vcmask 392192   ;;  %v3380_v2 = vld [vmem:[%s4566_s1] sm:$0xff]   ;;  %vm749_vm1 = vcmask 523264  }
  0x18   : > { %3174 = vmatprep.subr.bf16.mxu0 %v3378_v0  ;;  %v3389_v11 = vld [vmem:[%s4541_s3] sm:$0xff]   ;;  %s3512_s25 = smov 104   ;;  %s4573_s1 = smov 16  }
  0x19   : > { %3175 = vmatpush3.bf16.msra.mxu0 %v3378_v0  ;;  %s3089_s12 = sshll.u32 %s3637_s29, 6  ;;  %3204 = vmatprep.mubr.msk.bf16.mxu1 %vm749_vm1, %v3389_v11  ;;  %v3662_v16 = vld [vmem:[%s4568_s2] ss:$0 sm:$0xff] }
  0x1a   : > { %3176 = vmatprep.subr.bf16.mxu0 %v3379_v1  ;;  %s365_s21 = scalar_lea.vmem %s4567_s0, %s3089_s12  ;;  %s4557_s12 = smov 16  }
  0x1b   : > { %v3381_v3 = vld [vmem:[%s365_s21] sm:$0xff]   ;;  %v3382_v4 = vld [vmem:[%s365_s21 + $0x8] sm:$0xff]   ;;  %v3383_v5 = vld [vmem:[%s365_s21 + $0x10] sm:$0xff]   ;;  %s4574_s0 = smov 112  }
  0x1c   : > { %3180 = vmatprep.mubr.msk.bf16.mxu0 %vm459_vm0, %v3381_v3  ;;  %v3384_v6 = vld [vmem:[%s365_s21 + $0x18] sm:$0xff]   ;;  %v3385_v7 = vld [vmem:[%s365_s21 + $0x20] sm:$0xff]   ;;  %v3386_v8 = vld [vmem:[%s365_s21 + $0x28] sm:$0xff]  }
  0x1d   : > { %3177 = vmatpush3.bf16.msra.mxu0 %v3379_v1  ;;  %v3387_v9 = vld [vmem:[%s365_s21 + $0x30] sm:$0xff]   ;;  %v3388_v10 = vld [vmem:[%s365_s21 + $0x38] sm:$0xff]   ;;  %s3503_s21 = smov 40  }
  0x1e   : > { %3178 = vmatprep.subr.bf16.mxu0 %v3380_v2 }
  0x21   : > { %3179 = vmatpush3.bf16.msra.mxu0 %v3380_v2 }
  0x24   : > { %3181 = vmatmul.mubr.msk.bf16.vlgmr.msra.gmra.mxu0 %vm459_vm0, %v3382_v4  ;;  %v3390_v4 = vld [vmem:[%s4541_s3 + $0x8] sm:$0xff]  }
  0x25   : > { %3184 = vmatprep.mubr.msk.bf16.mxu0 %vm459_vm0, %v3383_v5 }
  0x2c   : > { %3185 = vmatmul.mubr.msk.bf16.gmra.mxu0 %vm459_vm0, %v3384_v6 }
  0x2d   : > { %3188 = vmatprep.mubr.msk.bf16.mxu0 %vm459_vm0, %v3385_v7 }
  0x34   : > { %3189 = vmatmul.mubr.msk.bf16.gmra.mxu0 %vm459_vm0, %v3386_v8  ;;  %v3391_v8 = vld [vmem:[%s4541_s3 + $0x10] sm:$0xff]  }
  0x35   : > { %3192 = vmatprep.mubr.msk.bf16.mxu0 %vm459_vm0, %v3387_v9 }
  0x3c   : > { %3193 = vmatmul.mubr.msk.bf16.gmra.mxu0 %vm459_vm0, %v3388_v10 }
  0x3d   : > { %3244 = vmatprep.mubr.msk.bf16.mxu0 %vm749_vm1, %v3389_v11 }
  0xe4   : > { %v3182_v12 = vpop.f32.mrf.mxu0 }
  0xe5   : > { %v527_v25 = vadd.f32 %v3182_v12, %v3662_v16 }
  0xe6   : > { %v518_v13 = vpop.f32.mrf.mxu0 }
  0xe7   : > { %v599_v38 = vmul.f32 0.01, %v527_v25  ;;  %v519_v39 = vadd.f32 %v3662_v16, %v518_v13  ;;  %vm583_vm7 = vcmp.ge.f32.partialorder %v527_v25, 0.0 }
  0xe8   : > { %v3183_v14 = vpop.f32.mrf.mxu0 }
  0xe9   : > { %v530_v21 = vadd.f32 %v3183_v14, %v3662_v16  ;;  %v597_v47 = vmul.f32 0.01, %v519_v39  ;;  %v615_v48 = vsel %vm583_vm7, %v527_v25, %v599_v38  ;;  %vm581_vm9 = vcmp.ge.f32.partialorder %v519_v39, 0.0  ;;  %v3394_v25 = vld [vmem:[%s4541_s3 + $0x28] sm:$0xff]  }
  0xea   : > { %v521_v15 = vpop.f32.mrf.mxu0  ;;  %vm1259_vm7 = vcmask 261120  }
  0xeb   : > { %v600_v30 = vmul.f32 0.01, %v530_v21  ;;  %v522_v31 = vadd.f32 %v3662_v16, %v521_v15  ;;  %vm584_vm6 = vcmp.ge.f32.partialorder %v530_v21, 0.0  ;;  %v613_v55 = vsel %vm581_vm9, %v519_v39, %v597_v47 }
  0xec   : > { %v3186_v17 = vpop.f32.mrf.mxu0  ;;  %vm1273_vm9 = vcmask 457728  }
  0xed   : > { %v543_v18 = vadd.f32 %v3186_v17, %v3662_v16  ;;  %v598_v44 = vmul.f32 0.01, %v522_v31  ;;  %v616_v45 = vsel %vm584_vm6, %v530_v21, %v600_v30  ;;  %vm582_vm8 = vcmp.ge.f32.partialorder %v522_v31, 0.0  ;;  %v3399_v30 = vld [vmem:[%s4541_s3 + $0x50] sm:$0xff]  }
  0xee   : > { %v534_v19 = vpop.f32.mrf.mxu0  ;;  %v630_v50 = vpack.c.bf16 %v616_v45, %v615_v48  ;;  %vm1254_vm6 = vcmask 195584  }
  0xef   : > { %v535_v20 = vadd.f32 %v3662_v16, %v534_v19  ;;  %v603_v23 = vmul.f32 0.01, %v543_v18  ;;  %vm587_vm2 = vcmp.ge.f32.partialorder %v543_v18, 0.0  ;;  %v614_v52 = vsel %vm582_vm8, %v522_v31, %v598_v44  ;;  %v3400_v31 = vld [vmem:[%s4541_s3 + $0x58] sm:$0xff]  }
  0xf0   : > { %v3187_v22 = vpop.f32.mrf.mxu0  ;;  %v629_v58 = vpack.c.bf16 %v614_v52, %v613_v55  ;;  %vm1264_vm8 = vcmask 326656  }
  0xf1   : > { %v546_v24 = vadd.f32 %v3187_v22, %v3662_v16  ;;  %v601_v27 = vmul.f32 0.01, %v535_v20  ;;  %vm585_vm4 = vcmp.ge.f32.partialorder %v535_v20, 0.0  ;;  %v619_v34 = vsel %vm587_vm2, %v543_v18, %v603_v23  ;;  %v3393_v22 = vld [vmem:[%s4541_s3 + $0x20] sm:$0xff]  }
  0xf2   : > { %v537_v26 = vpop.f32.mrf.mxu0 }
  0xf3   : > { %v604_v28 = vmul.f32 0.01, %v546_v24  ;;  %v538_v29 = vadd.f32 %v3662_v16, %v537_v26  ;;  %vm588_vm3 = vcmp.ge.f32.partialorder %v546_v24, 0.0  ;;  %v617_v40 = vsel %vm585_vm4, %v535_v20, %v601_v27  ;;  %v3395_v26 = vld [vmem:[%s4541_s3 + $0x30] sm:$0xff]   ;;  %v3396_v27 = vld [vmem:[%s4541_s3 + $0x38] sm:$0xff]  }
  0xf4   : > { %v3190_v32 = vpop.f32.mrf.mxu0  ;;  %vm1242_vm4 = vcmask 64512  }
  0xf5   : > { %vm586_vm5 = vcmp.ge.f32.partialorder %v538_v29, 0.0  ;;  %v602_v33 = vmul.f32 0.01, %v538_v29  ;;  %v620_v35 = vsel %vm588_vm3, %v546_v24, %v604_v28  ;;  %v559_v61 = vadd.f32 %v3190_v32, %v3662_v16  ;;  %v3397_v28 = vld [vmem:[%s4541_s3 + $0x40] sm:$0xff]  }
  0xf6   : > { %v550_v36 = vpop.f32.mrf.mxu0  ;;  %v632_v37 = vpack.c.bf16 %v620_v35, %v619_v34  ;;  %v3401_v32 = vld [vmem:[%s4541_s3 + $0x60] sm:$0xff]   ;;  %v3403_v34 = vld [vmem:[%s4541_s3 + $0x70] sm:$0xff]   ;;  %v3404_v35 = vld [vmem:[%s4541_s3 + $0x78] sm:$0xff]  }
  0xf7   : > { %v618_v41 = vsel %vm586_vm5, %v538_v29, %v602_v33  ;;  %v607_v10 = vmul.f32 0.01, %v559_v61  ;;  %v551_v11 = vadd.f32 %v3662_v16, %v550_v36  ;;  %vm591_vm15 = vcmp.ge.f32.partialorder %v559_v61, 0.0  ;;  %v3398_v29 = vld [vmem:[%s4541_s3 + $0x48] sm:$0xff]  }
  0xf8   : > { %v3191_v42 = vpop.f32.mrf.mxu0  ;;  %3196 = vmatprep.subr.bf16.mxu1 %v632_v37  ;;  %v631_v43 = vpack.c.bf16 %v618_v41, %v617_v40  ;;  %v3402_v33 = vld [vmem:[%s4541_s3 + $0x68] sm:$0xff]   ;;  %vm1249_vm5 = vcmask 130048  }
  0xf9   : > { %3197 = vmatpush3.bf16.msra.mxu1 %v632_v37  ;;  %v562_v56 = vadd.f32 %v3191_v42, %v3662_v16  ;;  %v605_v18 = vmul.f32 0.01, %v551_v11  ;;  %v623_v19 = vsel %vm591_vm15, %v559_v61, %v607_v10  ;;  %vm589_vm3 = vcmp.ge.f32.partialorder %v551_v11, 0.0 }
  0xfa   : > { %v553_v46 = vpop.f32.mrf.mxu0  ;;  %3198 = vmatprep.subr.bf16.mxu1 %v631_v43  ;;  %vm1307_vm15 = vcmask 916480  }
  0xfb   : > { %v608_v2 = vmul.f32 0.01, %v562_v56  ;;  %v554_v3 = vadd.f32 %v3662_v16, %v553_v46  ;;  %vm592_vm14 = vcmp.ge.f32.partialorder %v562_v56, 0.0  ;;  %v621_v23 = vsel %vm589_vm3, %v551_v11, %v605_v18 }
  0xfc   : > { %v3194_v49 = vpop.f32.mrf.mxu0  ;;  %vm1608_vm3 = vcmask 1041408  }
  0xfd   : > { %v575_v51 = vadd.f32 %v3194_v49, %v3662_v16  ;;  %3199 = vmatpush3.bf16.msra.mxu1 %v631_v43  ;;  %v606_v15 = vmul.f32 0.01, %v554_v3  ;;  %v624_v17 = vsel %vm592_vm14, %v562_v56, %v608_v2  ;;  %vm590_vm2 = vcmp.ge.f32.partialorder %v554_v3, 0.0 }
  0xfe   : > { %v566_v53 = vpop.f32.mrf.mxu0  ;;  %3200 = vmatprep.subr.bf16.mxu1 %v630_v50  ;;  %v634_v20 = vpack.c.bf16 %v624_v17, %v623_v19  ;;  %vm1302_vm14 = vcmask 850944  }
  0xff   : > { %v567_v54 = vadd.f32 %v3662_v16, %v566_v53  ;;  %v611_v59 = vmul.f32 0.01, %v575_v51  ;;  %vm595_vm10 = vcmp.ge.f32.partialorder %v575_v51, 0.0  ;;  %v622_v21 = vsel %vm590_vm2, %v554_v3, %v606_v15 }
 0x100   : > { %v3195_v57 = vpop.f32.mrf.mxu0  ;;  %v633_v24 = vpack.c.bf16 %v622_v21, %v621_v23  ;;  %vm1312_vm2 = vcmask 982016  }
 0x101   : > { %v578_v60 = vadd.f32 %v3195_v57, %v3662_v16  ;;  %3201 = vmatpush3.bf16.msra.mxu1 %v630_v50  ;;  %v609_v63 = vmul.f32 0.01, %v567_v54  ;;  %vm593_vm12 = vcmp.ge.f32.partialorder %v567_v54, 0.0  ;;  %v627_v6 = vsel %vm595_vm10, %v575_v51, %v611_v59  ;;  %v3405_v57 = vld [vmem:[%s4542_s4 + $0x38] sm:$0xff]  }
 0x102   : > { %v569_v62 = vpop.f32.mrf.mxu0  ;;  %3202 = vmatprep.subr.bf16.mxu1 %v629_v58  ;;  %vm1282_vm10 = vcmask 588800  }
 0x103   : > { %vm596_vm11 = vcmp.ge.f32.partialorder %v578_v60, 0.0  ;;  %v612_v0 = vmul.f32 0.01, %v578_v60  ;;  %v570_v1 = vadd.f32 %v3662_v16, %v569_v62  ;;  %v625_v12 = vsel %vm593_vm12, %v567_v54, %v609_v63  ;;  %v3392_v16 = vld [vmem:[%s4541_s3 + $0x18] sm:$0xff]  }
 0x104   : > { %vm1292_vm12 = vcmask 719872  }
 0x105   : > { %vm594_vm13 = vcmp.ge.f32.partialorder %v570_v1, 0.0  ;;  %v610_v5 = vmul.f32 0.01, %v570_v1  ;;  %3203 = vmatpush3.bf16.msra.mxu1 %v629_v58  ;;  %v628_v7 = vsel %vm596_vm11, %v578_v60, %v612_v0  ;;  %vm1287_vm11 = vcmask 654336  }
 0x106   : > { %v636_v9 = vpack.c.bf16 %v628_v7, %v627_v6  ;;  %3276 = vmatprep.subr.bf16.mxu1 %v3405_v57  ;;  %v3406_v6 = vld [vmem:[%s4542_s4 + $0x30] sm:$0xff]  }
 0x107   : > { %v626_v13 = vsel %vm594_vm13, %v570_v1, %v610_v5  ;;  %vm1297_vm13 = vcmask 785408  }
 0x108   : > { %3205 = vmatmul.mubr.msk.bf16.vlgmr.msra.gmra.mxu1 %vm749_vm1, %v3390_v4  ;;  %3236 = vmatprep.subr.bf16.mxu0 %v636_v9  ;;  %v635_v14 = vpack.c.bf16 %v626_v13, %v625_v12 }
 0x109   : > { %3237 = vmatpush3.bf16.msra.mxu0 %v636_v9  ;;  %3208 = vmatprep.mubr.msk.bf16.mxu1 %vm749_vm1, %v3391_v8 }
 0x10a   : > { %3238 = vmatprep.subr.bf16.mxu0 %v635_v14  ;;  %3277 = vmatpush3.bf16.msra.mxu1 %v3405_v57 }
 0x10b   : > { %3278 = vmatprep.subr.bf16.mxu1 %v3406_v6 }
 0x10d   : > { %3239 = vmatpush3.bf16.msra.mxu0 %v635_v14 }
 0x10e   : > { %3240 = vmatprep.subr.bf16.mxu0 %v634_v20  ;;  %3279 = vmatpush3.bf16.msra.mxu1 %v3406_v6 }
 0x110   : > { %3209 = vmatmul.mubr.msk.bf16.gmra.mxu1 %vm749_vm1, %v3392_v16 }
 0x111   : > { %3241 = vmatpush3.bf16.msra.mxu0 %v634_v20  ;;  %3212 = vmatprep.mubr.msk.bf16.mxu1 %vm749_vm1, %v3393_v22  ;;  %v3407_v20 = vld [vmem:[%s4542_s4 + $0x28] sm:$0xff]  }
 0x112   : > { %3242 = vmatprep.subr.bf16.mxu0 %v633_v24  ;;  %3280 = vmatprep.subr.bf16.mxu1 %v3407_v20 }
 0x113   : > { %3281 = vmatpush3.bf16.msra.mxu1 %v3407_v20  ;;  %v3820_v20 = vld [vmem:[%s4544_s6 + $0xc] sm:$0xf] }
 0x115   : > { %3243 = vmatpush3.bf16.msra.mxu0 %v633_v24 }
 0x118   : > { %3245 = vmatmul.mubr.msk.bf16.vlgmr.msra.gmra.mxu0 %vm749_vm1, %v3390_v4  ;;  %3213 = vmatmul.mubr.msk.bf16.gmra.mxu1 %vm749_vm1, %v3394_v25 }
 0x119   : > { %3248 = vmatprep.mubr.msk.bf16.mxu0 %vm749_vm1, %v3391_v8  ;;  %3216 = vmatprep.mubr.msk.bf16.mxu1 %vm749_vm1, %v3395_v26 }
 0x120   : > { %3249 = vmatmul.mubr.msk.bf16.gmra.mxu0 %vm749_vm1, %v3392_v16  ;;  %3217 = vmatmul.mubr.msk.bf16.gmra.mxu1 %vm749_vm1, %v3396_v27 }
 0x121   : > { %3252 = vmatprep.mubr.msk.bf16.mxu0 %vm749_vm1, %v3393_v22  ;;  %3220 = vmatprep.mubr.msk.bf16.mxu1 %vm749_vm1, %v3397_v28 }
 0x128   : > { %3253 = vmatmul.mubr.msk.bf16.gmra.mxu0 %vm749_vm1, %v3394_v25  ;;  %3221 = vmatmul.mubr.msk.bf16.gmra.mxu1 %vm749_vm1, %v3398_v29 }
 0x129   : > { %3256 = vmatprep.mubr.msk.bf16.mxu0 %vm749_vm1, %v3395_v26  ;;  %3224 = vmatprep.mubr.msk.bf16.mxu1 %vm749_vm1, %v3399_v30 }
 0x130   : > { %3257 = vmatmul.mubr.msk.bf16.gmra.mxu0 %vm749_vm1, %v3396_v27  ;;  %3225 = vmatmul.mubr.msk.bf16.gmra.mxu1 %vm749_vm1, %v3400_v31 }
 0x131   : > { %3260 = vmatprep.mubr.msk.bf16.mxu0 %vm749_vm1, %v3397_v28  ;;  %3228 = vmatprep.mubr.msk.bf16.mxu1 %vm749_vm1, %v3401_v32 }
 0x138   : > { %3261 = vmatmul.mubr.msk.bf16.gmra.mxu0 %vm749_vm1, %v3398_v29  ;;  %3229 = vmatmul.mubr.msk.bf16.gmra.mxu1 %vm749_vm1, %v3402_v33 }
 0x139   : > { %3264 = vmatprep.mubr.msk.bf16.mxu0 %vm749_vm1, %v3399_v30  ;;  %3232 = vmatprep.mubr.msk.bf16.mxu1 %vm749_vm1, %v3403_v34 }
 0x140   : > { %3265 = vmatmul.mubr.msk.bf16.gmra.mxu0 %vm749_vm1, %v3400_v31  ;;  %3233 = vmatmul.mubr.msk.bf16.gmra.mxu1 %vm749_vm1, %v3404_v35 }
 0x141   : > { %3268 = vmatprep.mubr.msk.bf16.mxu0 %vm749_vm1, %v3401_v32  ;;  %v3408_v32 = vld [vmem:[%s4542_s4 + $0x20] sm:$0xff]  }
 0x142   : > { %3282 = vmatprep.subr.bf16.mxu1 %v3408_v32 }
 0x143   : > { %3283 = vmatpush3.bf16.msra.mxu1 %v3408_v32 }
 0x148   : > { %3269 = vmatmul.mubr.msk.bf16.gmra.mxu0 %vm749_vm1, %v3402_v33 }
 0x149   : > { %3272 = vmatprep.mubr.msk.bf16.mxu0 %vm749_vm1, %v3403_v34 }
 0x150   : > { %3273 = vmatmul.mubr.msk.bf16.gmra.mxu0 %vm749_vm1, %v3404_v35 }
 0x1c8   : > { %v3206_v36 = vpop.f32.mrf.mxu1 }
 0x1ca   : > { %v3755_v37 = vpop.f32.mrf.mxu1 }
 0x1cc   : > { %v3207_v38 = vpop.f32.mrf.mxu1 }
 0x1cd   : > { %v1121_v39 = vpack.c.bf16 %v3207_v38, %v3206_v36 }
 0x1ce   : > { %v3757_v40 = vpop.f32.mrf.mxu1 }
 0x1cf   : > { %v1120_v41 = vpack.c.bf16 %v3757_v40, %v3755_v37  ;;  %1154 = vrot.lane.b32.xlu0 %v1121_v39, %s3500_s30 }
 0x1d0   : > { %v3210_v42 = vpop.f32.mrf.mxu1 }
 0x1d2   : > { %v848_v43 = vpop.f32.mrf.mxu1 }
 0x1d4   : > { %v3211_v44 = vpop.f32.mrf.mxu1 }
 0x1d5   : > { %v1123_v45 = vpack.c.bf16 %v3211_v44, %v3210_v42 }
 0x1d6   : > { %v851_v46 = vpop.f32.mrf.mxu1 }
 0x1d7   : > { %v1122_v47 = vpack.c.bf16 %v851_v46, %v848_v43  ;;  %1166 = vrot.lane.b32.xlu0 %v1123_v45, %s3501_s11  ;;  %v3510_v45 = vmov 1  }
 0x1d8   : > { %v3246_v48 = vpop.f32.mrf.mxu0  ;;  %v3214_v49 = vpop.f32.mrf.mxu1  ;;  %3361 = vset.pattern.permute.xlu1 %v3510_v45  ;;  %3360 = vset.pattern.permute.xlu0 %v3510_v45 }
 0x1d9   : > { %1160 = vrot.lane.b32.xlu1 %v1122_v47, %s4557_s12 }
 0x1da   : > { %v3763_v50 = vpop.f32.mrf.mxu0  ;;  %v864_v51 = vpop.f32.mrf.mxu1 }
 0x1dc   : > { %v3247_v52 = vpop.f32.mrf.mxu0  ;;  %v3215_v53 = vpop.f32.mrf.mxu1 }
 0x1dd   : > { %v1137_v54 = vpack.c.bf16 %v3247_v52, %v3246_v48  ;;  %v1125_v58 = vpack.c.bf16 %v3215_v53, %v3214_v49  ;;  %v3409_v49 = vld [vmem:[%s4542_s4 + $0x18] sm:$0xff]  }
 0x1de   : > { %v3765_v55 = vpop.f32.mrf.mxu0  ;;  %v867_v56 = vpop.f32.mrf.mxu1  ;;  %3284 = vmatprep.subr.bf16.mxu1 %v3409_v49 }
 0x1df   : > { %v1136_v59 = vpack.c.bf16 %v3765_v55, %v3763_v50  ;;  %1156 = vrot.lane.b32.xlu0 %v1137_v54, %s3500_s30  ;;  %v1124_v0 = vpack.c.bf16 %v867_v56, %v864_v51  ;;  %s3509_s30 = smov 88   ;;  %3285 = vmatpush3.bf16.msra.mxu1 %v3409_v49 }
 0x1e0   : > { %v3250_v60 = vpop.f32.mrf.mxu0  ;;  %v3218_v61 = vpop.f32.mrf.mxu1 }
 0x1e2   : > { %v1009_v62 = vpop.f32.mrf.mxu0  ;;  %v880_v63 = vpop.f32.mrf.mxu1 }
 0x1e3   : > { %1178 = vrot.lane.b32.xlu0 %v1125_v58, %s3503_s21 }
 0x1e4   : > { %v3251_v1 = vpop.f32.mrf.mxu0  ;;  %v3219_v2 = vpop.f32.mrf.mxu1 }
 0x1e5   : > { %v1139_v3 = vpack.c.bf16 %v3251_v1, %v3250_v60  ;;  %v1127_v7 = vpack.c.bf16 %v3219_v2, %v3218_v61  ;;  %v3410_v60 = vld [vmem:[%s4542_s4 + $0x10] sm:$0xff]   ;;  %v3411_v2 = vld [vmem:[%s4542_s4 + $0x8] sm:$0xff]  }
 0x1e6   : > { %v1012_v4 = vpop.f32.mrf.mxu0  ;;  %v883_v5 = vpop.f32.mrf.mxu1  ;;  %3286 = vmatprep.subr.bf16.mxu1 %v3410_v60 }
 0x1e7   : > { %1168 = vrot.lane.b32.xlu1 %v1139_v3, %s3501_s11  ;;  %1172 = vrot.lane.b32.xlu0 %v1124_v0, %s3504_s27  ;;  %v1138_v10 = vpack.c.bf16 %v1012_v4, %v1009_v62  ;;  %v1126_v13 = vpack.c.bf16 %v883_v5, %v880_v63 }
 0x1e8   : > { %v3254_v8 = vpop.f32.mrf.mxu0  ;;  %v3222_v9 = vpop.f32.mrf.mxu1  ;;  %3287 = vmatpush3.bf16.msra.mxu1 %v3410_v60 }
 0x1e9   : > { %3288 = vmatprep.subr.bf16.mxu1 %v3411_v2 }
 0x1ea   : > { %v1025_v11 = vpop.f32.mrf.mxu0  ;;  %v896_v12 = vpop.f32.mrf.mxu1 }
 0x1eb   : > { %1162 = vrot.lane.b32.xlu1 %v1138_v10, %s4557_s12  ;;  %1190 = vrot.lane.b32.xlu0 %v1127_v7, %s3505_s28 }
 0x1ec   : > { %v3255_v14 = vpop.f32.mrf.mxu0  ;;  %v3223_v15 = vpop.f32.mrf.mxu1  ;;  %3289 = vmatpush3.bf16.msra.mxu1 %v3411_v2 }
 0x1ed   : > { %v1141_v17 = vpack.c.bf16 %v3255_v14, %v3254_v8  ;;  %v1129_v16 = vpack.c.bf16 %v3223_v15, %v3222_v9  ;;  %v3412_v8 = vld [vmem:[%s4542_s4] sm:$0xff]  }
 0x1ee   : > { %v1028_v18 = vpop.f32.mrf.mxu0  ;;  %v899_v19 = vpop.f32.mrf.mxu1  ;;  %3290 = vmatprep.subr.bf16.mxu1 %v3412_v8  ;;  %v3812_v15 = vld [vmem:[%s4544_s6] sm:$0xf] }
 0x1ef   : > { %1180 = vrot.lane.b32.xlu1 %v1141_v17, %s3503_s21  ;;  %1184 = vrot.lane.b32.xlu0 %v1126_v13, %s4549_s18  ;;  %v1140_v23 = vpack.c.bf16 %v1028_v18, %v1025_v11  ;;  %v1128_v26 = vpack.c.bf16 %v899_v19, %v896_v12  ;;  %s4553_s21 = smov 80   ;;  %v3516_v18 = vmov 0  }
 0x1f0   : > { %v3258_v21 = vpop.f32.mrf.mxu0  ;;  %v3226_v22 = vpop.f32.mrf.mxu1  ;;  %3291 = vmatpush3.bf16.msra.mxu1 %v3412_v8  ;;  %2468 = vmatprep.subr.bf16.mxu0 %v3516_v18 }
 0x1f2   : > { %v1041_v24 = vpop.f32.mrf.mxu0  ;;  %v912_v25 = vpop.f32.mrf.mxu1 }
 0x1f3   : > { %1174 = vrot.lane.b32.xlu1 %v1140_v23, %s3504_s27  ;;  %1202 = vrot.lane.b32.xlu0 %v1129_v16, %s3507_s20  ;;  %v3517_v23 = vmov 2  }
 0x1f4   : > { %v3259_v27 = vpop.f32.mrf.mxu0  ;;  %v3227_v28 = vpop.f32.mrf.mxu1 }
 0x1f5   : > { %v1143_v29 = vpack.c.bf16 %v3259_v27, %v3258_v21  ;;  %v1131_v33 = vpack.c.bf16 %v3227_v28, %v3226_v22  ;;  %v3827_v22 = vld [vmem:[%s4544_s6 + $0x4] sm:$0xf]  ;;  %v3520_v27 = vmov 6   ;;  %v3521_v28 = vmov 4  }
 0x1f6   : > { %v1044_v30 = vpop.f32.mrf.mxu0  ;;  %v915_v31 = vpop.f32.mrf.mxu1 }
 0x1f7   : > { %1192 = vrot.lane.b32.xlu1 %v1143_v29, %s3505_s28  ;;  %1196 = vrot.lane.b32.xlu0 %v1128_v26, %s4551_s26  ;;  %v1142_v36 = vpack.c.bf16 %v1044_v30, %v1041_v24  ;;  %v1130_v42 = vpack.c.bf16 %v915_v31, %v912_v25  ;;  %s4555_s28 = smov 112   ;;  %v3518_v24 = vmov 3   ;;  %v3835_v25 = vld [vmem:[%s4544_s6 + $0x8] sm:$0xf]  ;;  %v3519_v26 = vmov 5  }
 0x1f8   : > { %v3262_v34 = vpop.f32.mrf.mxu0  ;;  %v3230_v35 = vpop.f32.mrf.mxu1  ;;  %v3522_v29 = vmov 7   ;;  %v3523_v31 = vmov 8  }
 0x1fa   : > { %v1057_v38 = vpop.f32.mrf.mxu0  ;;  %v928_v39 = vpop.f32.mrf.mxu1 }
 0x1fb   : > { %1186 = vrot.lane.b32.xlu1 %v1142_v36, %s4549_s18  ;;  %1214 = vrot.lane.b32.xlu0 %v1131_v33, %s3509_s30  ;;  %s4570_s18 = smov 48  }
 0x1fc   : > { %v3263_v43 = vpop.f32.mrf.mxu0  ;;  %v3231_v44 = vpop.f32.mrf.mxu1 }
 0x1fd   : > { %v1145_v46 = vpack.c.bf16 %v3263_v43, %v3262_v34  ;;  %v1133_v51 = vpack.c.bf16 %v3231_v44, %v3230_v35 }
 0x1fe   : > { %v1060_v47 = vpop.f32.mrf.mxu0  ;;  %v931_v48 = vpop.f32.mrf.mxu1 }
 0x1ff   : > { %1204 = vrot.lane.b32.xlu1 %v1145_v46, %s3507_s20  ;;  %1208 = vrot.lane.b32.xlu0 %v1130_v42, %s4553_s21  ;;  %v1144_v54 = vpack.c.bf16 %v1060_v47, %v1057_v38  ;;  %v1132_v58 = vpack.c.bf16 %v931_v48, %v928_v39  ;;  %s4571_s20 = smov 80  }
 0x200   : > { %v3266_v52 = vpop.f32.mrf.mxu0  ;;  %v3234_v53 = vpop.f32.mrf.mxu1 }
 0x202   : > { %v1073_v56 = vpop.f32.mrf.mxu0  ;;  %v944_v57 = vpop.f32.mrf.mxu1 }
 0x203   : > { %1198 = vrot.lane.b32.xlu1 %v1144_v54, %s4551_s26  ;;  %1226 = vrot.lane.b32.xlu0 %v1133_v51, %s3512_s25  ;;  %s4559_s26 = smov 96  }
 0x204   : > { %v3267_v61 = vpop.f32.mrf.mxu0  ;;  %v3235_v62 = vpop.f32.mrf.mxu1 }
 0x205   : > { %v1147_v63 = vpack.c.bf16 %v3267_v61, %v3266_v52  ;;  %v1135_v7 = vpack.c.bf16 %v3235_v62, %v3234_v53 }
 0x206   : > { %v1076_v0 = vpop.f32.mrf.mxu0  ;;  %v947_v1 = vpop.f32.mrf.mxu1 }
 0x207   : > { %1216 = vrot.lane.b32.xlu1 %v1147_v63, %s3509_s30  ;;  %1220 = vrot.lane.b32.xlu0 %v1132_v58, %s4559_s26  ;;  %v1134_v3 = vpack.c.bf16 %v947_v1, %v944_v57  ;;  %v1146_v5 = vpack.c.bf16 %v1076_v0, %v1073_v56  ;;  %s3515_s30 = smov 120  }
 0x208   : > { %v3270_v4 = vpop.f32.mrf.mxu0 }
 0x20a   : > { %v1089_v6 = vpop.f32.mrf.mxu0 }
 0x20b   : > { %1210 = vrot.lane.b32.xlu1 %v1146_v5, %s4553_s21  ;;  %1232 = vrot.lane.b32.xlu0 %v1134_v3, %s4555_s28  ;;  %s4569_s21 = smov 64  }
 0x20c   : > { %v3271_v9 = vpop.f32.mrf.mxu0 }
 0x20d   : > { %v1149_v10 = vpack.c.bf16 %v3271_v9, %v3270_v4 }
 0x20e   : > { %v1092_v11 = vpop.f32.mrf.mxu0 }
 0x20f   : > { %1228 = vrot.lane.b32.xlu1 %v1149_v10, %s3512_s25  ;;  %1238 = vrot.lane.b32.xlu0 %v1135_v7, %s3515_s30  ;;  %v1148_v13 = vpack.c.bf16 %v1092_v11, %v1089_v6 }
 0x210   : > { %v3274_v12 = vpop.f32.mrf.mxu0 }
 0x212   : > { %v1105_v14 = vpop.f32.mrf.mxu0 }
 0x213   : > { %1222 = vrot.lane.b32.xlu1 %v1148_v13, %s4559_s26  ;;  %1555 = vperm.xlu0 %3360, %v3812_v15  }
 0x214   : > { %v3275_v17 = vpop.f32.mrf.mxu0 }
 0x215   : > { %v1151_v21 = vpack.c.bf16 %v3275_v17, %v3274_v12 }
 0x216   : > { %v1108_v19 = vpop.f32.mrf.mxu0 }
 0x217   : > { %v1150_v16 = vpack.c.bf16 %v1108_v19, %v1105_v14  ;;  %1588 = vperm.xlu0 %3360, %v3820_v20  }
 0x219   : > { %1234 = vrot.lane.b32.xlu1 %v1150_v16, %s4555_s28 }
 0x21b   : > { %3363 = vset.pattern.permute.xlu0 %v3517_v23 }
 0x21c   : > { %1630 = vperm.xlu0 %3363, %v3827_v22  }
 0x21d   : > { %1240 = vrot.lane.b32.xlu1 %v1151_v21, %s3515_s30  ;;  %s358_s30 = sand.u32 1, %s3490_s14  }
 0x21e   : > { %s2957_s2 = sshll.u32 %s358_s30, 1 }
 0x21f   : > { %s360_s11 = scalar_lea.vmem [#allocation2], %s2957_s2 }
 0x220   : > { %3364 = vset.pattern.permute.xlu0 %v3518_v24 }
 0x221   : > { %1566 = vperm.xlu1 %3361, %v3827_v22   ;;  %1697 = vperm.xlu0 %3364, %v3812_v15  }
 0x225   : > { %1577 = vperm.xlu1 %3361, %v3835_v25   ;;  %1730 = vperm.xlu0 %3364, %v3820_v20  }
 0x229   : > { %3362 = vset.pattern.permute.xlu1 %v3517_v23  ;;  %3367 = vset.pattern.permute.xlu0 %v3519_v26 }
 0x22a   : > { %1619 = vperm.xlu1 %3362, %v3812_v15   ;;  %1847 = vperm.xlu0 %3367, %v3827_v22  }
 0x22e   : > { %1641 = vperm.xlu1 %3362, %v3835_v25   ;;  %3368 = vset.pattern.permute.xlu0 %v3520_v27 }
 0x22f   : > { %1914 = vperm.xlu0 %3368, %v3812_v15  }
 0x232   : > { %1652 = vperm.xlu1 %3362, %v3820_v20  }
 0x233   : > { %1947 = vperm.xlu0 %3368, %v3820_v20  }
 0x236   : > { %3365 = vset.pattern.permute.xlu1 %v3518_v24 }
 0x237   : > { %1708 = vperm.xlu1 %3365, %v3827_v22   ;;  %3371 = vset.pattern.permute.xlu0 %v3521_v28 }
 0x238   : > { %1786 = vperm.xlu0 %3371, %v3827_v22  }
 0x23b   : > { %1719 = vperm.xlu1 %3365, %v3835_v25  }
 0x23c   : > { %3372 = vset.pattern.permute.xlu0 %v3522_v29 }
 0x23d   : > { %1992 = vperm.xlu0 %3372, %v3812_v15  }
 0x23f   : > { %3366 = vset.pattern.permute.xlu1 %v3519_v26 }
 0x240   : > { %1836 = vperm.xlu1 %3366, %v3812_v15  }
 0x241   : > { %2025 = vperm.xlu0 %3372, %v3820_v20   ;;  %v1155_v30 = vpop.permute.xlu0 %1154 }
 0x242   : > { %v1245_v47 = vsel %vm1242_vm4, %v1120_v41, %v1155_v30 }
 0x244   : > { %1858 = vperm.xlu1 %3366, %v3835_v25  }
 0x245   : > { %3375 = vset.pattern.permute.xlu0 %v3516_v18 }
 0x246   : > { %1486 = vperm.xlu0 %3375, %v3827_v22  }
 0x248   : > { %1869 = vperm.xlu1 %3366, %v3820_v20  }
 0x249   : > { %v1167_v32 = vpop.permute.xlu0 %1166 }
 0x24a   : > { %3376 = vset.pattern.permute.xlu0 %v3523_v31 }
 0x24b   : > { %2056 = vperm.xlu0 %3376, %v3812_v15   ;;  %v1161_v34 = vpop.permute.xlu1 %1160 }
 0x24c   : > { %3369 = vset.pattern.permute.xlu1 %v3520_v27  ;;  %v1251_v48 = vsel %vm1249_vm5, %v1245_v47, %v1161_v34  ;;  %v3524_v27 = vmov 839922192  }
 0x24d   : > { %1925 = vperm.xlu1 %3369, %v3827_v22   ;;  %v1256_v52 = vsel %vm1254_vm6, %v1251_v48, %v1167_v32 }
 0x24f   : > { %2089 = vperm.xlu0 %3376, %v3820_v20  }
 0x251   : > { %v1157_v33 = vpop.permute.xlu0 %1156  ;;  %1936 = vperm.xlu1 %3369, %v3835_v25  }
 0x252   : > { %v1248_v63 = vsel %vm1242_vm4, %v1136_v59, %v1157_v33  ;;  %vm1672_vm4 = vsmask.f32 2304 }
 0x255   : > { %v1179_v35 = vpop.permute.xlu0 %1178  ;;  %3370 = vset.pattern.permute.xlu1 %v3521_v28  ;;  %v1478_v28 = vunpack.c.l.s4 %v3524_v27 }
 0x256   : > { %1775 = vperm.xlu1 %3370, %v3812_v15  }
 0x259   : > { %v1169_v36 = vpop.permute.xlu1 %1168  ;;  %v1173_v38 = vpop.permute.xlu0 %1172 }
 0x25a   : > { %1797 = vperm.xlu1 %3370, %v3835_v25   ;;  %v1261_v53 = vsel %vm1259_vm7, %v1256_v52, %v1173_v38 }
 0x25b   : > { %v1266_v37 = vsel %vm1264_vm8, %v1261_v53, %v1179_v35 }
 0x25d   : > { %v1163_v39 = vpop.permute.xlu1 %1162  ;;  %v1191_v42 = vpop.permute.xlu0 %1190 }
 0x25e   : > { %1808 = vperm.xlu1 %3370, %v3820_v20   ;;  %v1253_v0 = vsel %vm1249_vm5, %v1248_v63, %v1163_v39 }
 0x25f   : > { %v1258_v5 = vsel %vm1254_vm6, %v1253_v0, %v1169_v36  ;;  %vm1750_vm6 = vsmask.f32 3328 }
 0x261   : > { %v1181_v43 = vpop.permute.xlu1 %1180  ;;  %v1185_v44 = vpop.permute.xlu0 %1184 }
 0x262   : > { %3373 = vset.pattern.permute.xlu1 %v3522_v29  ;;  %v1270_v40 = vsel %vm459_vm0, %v1266_v37, %v1185_v44  ;;  %v1480_v29 = vlaneseq }
 0x263   : > { %2003 = vperm.xlu1 %3373, %v3827_v22   ;;  %v1275_v58 = vsel %vm1273_vm9, %v1270_v40, %v1191_v42 }
 0x264   : > { %v1481_v32 = vshrl.u32 %v1480_v29, 7 }
 0x265   : > { %v1175_v45 = vpop.permute.xlu1 %1174  ;;  %v1203_v46 = vpop.permute.xlu0 %1202 }
 0x266   : > { %v1263_v50 = vsel %vm1259_vm7, %v1258_v5, %v1175_v45 }
 0x267   : > { %2014 = vperm.xlu1 %3373, %v3835_v25   ;;  %v1268_v8 = vsel %vm1264_vm8, %v1263_v50, %v1181_v43  ;;  %vm2045_vm8 = vcmask 1045504  }
 0x269   : > { %v1193_v49 = vpop.permute.xlu1 %1192  ;;  %v1197_v51 = vpop.permute.xlu0 %1196 }
 0x26a   : > { %v1279_v60 = vsel %vm749_vm1, %v1275_v58, %v1197_v51 }
 0x26b   : > { %3374 = vset.pattern.permute.xlu1 %v3516_v18  ;;  %v1284_v1 = vsel %vm1282_vm10, %v1279_v60, %v1203_v46 }
 0x26c   : > { %1474 = vperm.xlu1 %3374, %v3812_v15  }
 0x26d   : > { %v1187_v54 = vpop.permute.xlu1 %1186  ;;  %v1215_v56 = vpop.permute.xlu0 %1214 }
 0x26e   : > { %v1272_v9 = vsel %vm459_vm0, %v1268_v8, %v1187_v54 }
 0x26f   : > { %v1277_v14 = vsel %vm1273_vm9, %v1272_v9, %v1193_v49  ;;  %vm1889_vm9 = vsmask.f32 4352 }
 0x270   : > { %1498 = vperm.xlu1 %3374, %v3835_v25  }
 0x271   : > { %v1205_v41 = vpop.permute.xlu1 %1204  ;;  %v1209_v57 = vpop.permute.xlu0 %1208 }
 0x272   : > { %v1289_v2 = vsel %vm1287_vm11, %v1284_v1, %v1209_v57 }
 0x273   : > { %v1294_v55 = vsel %vm1292_vm12, %v1289_v2, %v1215_v56 }
 0x274   : > { %1510 = vperm.xlu1 %3374, %v3820_v20  }
 0x275   : > { %v1199_v61 = vpop.permute.xlu1 %1198  ;;  %v1227_v62 = vpop.permute.xlu0 %1226 }
 0x276   : > { %v1281_v17 = vsel %vm749_vm1, %v1277_v14, %v1199_v61 }
 0x277   : > { %v1286_v19 = vsel %vm1282_vm10, %v1281_v17, %v1205_v41  ;;  %vm1967_vm10 = vsmask.f32 5376 }
 0x278   : > { %3377 = vset.pattern.permute.xlu1 %v3523_v31  ;;  %v1479_v31 = vunpack.c.0.s8 %v1478_v28 }
 0x279   : > { %v1217_v3 = vpop.permute.xlu1 %1216  ;;  %v1221_v4 = vpop.permute.xlu0 %1220  ;;  %2067 = vperm.xlu1 %3377, %v3827_v22  }
 0x27a   : > { %v1299_v59 = vsel %vm1297_vm13, %v1294_v55, %v1221_v4  ;;  %v3906_v33 = vsub.s32 %v1479_v31, %v1481_v32 }
 0x27b   : > { %v1304_v10 = vsel %vm1302_vm14, %v1299_v59, %v1227_v62 }
 0x27d   : > { %v1211_v6 = vpop.permute.xlu1 %1210  ;;  %v1233_v7 = vpop.permute.xlu0 %1232  ;;  %2078 = vperm.xlu1 %3377, %v3835_v25  }
 0x27e   : > { %v1309_v11 = vsel %vm1307_vm15, %v1304_v10, %v1233_v7  ;;  %v1291_v20 = vsel %vm1287_vm11, %v1286_v19, %v1211_v6 }
 0x27f   : > { %v1296_v21 = vsel %vm1292_vm12, %v1291_v20, %v1217_v3  ;;  %vm1530_vm12 = vsmask.f32 1280 }
 0x281   : > { %v1229_v12 = vpop.permute.xlu1 %1228  ;;  %v1239_v13 = vpop.permute.xlu0 %1238 }
 0x282   : > { %v1314_v15 = vsel %vm1312_vm2, %v1309_v11, %v1239_v13 }
 0x283   : > { %3292 = vmatprep.mubr.bf16.mxu1 %v1314_v15 }
 0x285   : > { %v1223_v16 = vpop.permute.xlu1 %1222 }
 0x286   : > { %v1301_v22 = vsel %vm1297_vm13, %v1296_v21, %v1223_v16 }
 0x287   : > { %v1306_v24 = vsel %vm1302_vm14, %v1301_v22, %v1229_v12 }
 0x28b   : > { %v1235_v23 = vpop.permute.xlu1 %1234 }
 0x28c   : > { %v1311_v25 = vsel %vm1307_vm15, %v1306_v24, %v1235_v23 }
 0x28e   : > { %v1556_v34 = vpop.permute.xlu0 %1555 }
 0x28f   : > { %v1241_v26 = vpop.permute.xlu1 %1240  ;;  %v1564_v35 = vrot.slane %v1556_v34, %v3906_v33 }
 0x290   : > { %v1317_v30 = vsel %vm1312_vm2, %v1311_v25, %v1241_v26 }
 0x291   : > { %3293 = vmatmul.mubr.bf16.vlgmr.msra.gmra.mxu1 %v1317_v30 }
 0x292   : > { %v1589_v39 = vpop.permute.xlu0 %1588 }
 0x293   : > { %v1597_v43 = vrot.slane %v1589_v39, %v3906_v33 }
 0x297   : > { %v1631_v48 = vpop.permute.xlu0 %1630 }
 0x298   : > { %v1639_v49 = vrot.slane %v1631_v48, %v3906_v33 }
 0x29c   : > { %v1567_v36 = vpop.permute.xlu1 %1566  ;;  %v1698_v57 = vpop.permute.xlu0 %1697 }
 0x29d   : > { %v1575_v38 = vrot.slane %v1567_v36, %v3906_v33  ;;  %v1706_v61 = vrot.slane %v1698_v57, %v3906_v33 }
 0x29f   : > { %v3910_v42 = vcombine.low %v1564_v35, %v1575_v38 }
 0x2a0   : > { %v1578_v44 = vpop.permute.xlu1 %1577  ;;  %v1731_v0 = vpop.permute.xlu0 %1730 }
 0x2a1   : > { %v1586_v45 = vrot.slane %v1578_v44, %v3906_v33  ;;  %v1609_v46 = vrot.slane %v3910_v42, 6  ;;  %v1739_v2 = vrot.slane %v1731_v0, %v3906_v33 }
 0x2a3   : > { %v3915_v47 = vcombine.low %v1586_v45, %v1597_v43 }
 0x2a5   : > { %v1620_v51 = vpop.permute.xlu1 %1619  ;;  %v1610_v52 = vrot.slane %v3915_v47, 6  ;;  %v1848_v50 = vpop.permute.xlu0 %1847 }
 0x2a6   : > { %v1628_v53 = vrot.slane %v1620_v51, %v3906_v33  ;;  %v1856_v55 = vrot.slane %v1848_v50, %v3906_v33 }
 0x2a7   : > { %v3924_v54 = vsel %vm1608_vm3, %v1609_v46, %v1610_v52 }
 0x2a8   : > { %v3043_v56 = vcombine.low %v1628_v53, %v1639_v49 }
 0x2a9   : > { %v1642_v37 = vpop.permute.xlu1 %1641 }
 0x2aa   : > { %v1650_v40 = vrot.slane %v1642_v37, %v3906_v33  ;;  %v1915_v13 = vpop.permute.xlu0 %1914  ;;  %v1674_v26 = vshrl.u32 %v3043_v56, 16  ;;  %v1677_v27 = vshll.u32 %v3043_v56, 16 }
 0x2ab   : > { %v1923_v14 = vrot.slane %v1915_v13, %v3906_v33 }
 0x2ac   : > { %v1676_v43 = vrot.slane %v1674_v26, 5  ;;  %v1679_v44 = vrot.slane %v1677_v27, 6 }
 0x2ad   : > { %v1653_v41 = vpop.permute.xlu1 %1652 }
 0x2ae   : > { %v1661_v58 = vrot.slane %v1653_v41, %v3906_v33  ;;  %v1948_v16 = vpop.permute.xlu0 %1947 }
 0x2af   : > { %v1956_v29 = vrot.slane %v1948_v16, %v3906_v33 }
 0x2b0   : > { %v3044_v60 = vcombine.low %v1650_v40, %v1661_v58 }
 0x2b2   : > { %v1709_v62 = vpop.permute.xlu1 %1708  ;;  %v1682_v32 = vshrl.u32 %v3044_v60, 16  ;;  %v1685_v34 = vshll.u32 %v3044_v60, 16 }
 0x2b3   : > { %v1717_v63 = vrot.slane %v1709_v62, %v3906_v33  ;;  %v1787_v22 = vpop.permute.xlu0 %1786 }
 0x2b4   : > { %v1795_v23 = vrot.slane %v1787_v22, %v3906_v33  ;;  %v1684_v49 = vrot.slane %v1682_v32, 5  ;;  %v1687_v51 = vrot.slane %v1685_v34, 6 }
 0x2b5   : > { %v3045_v1 = vcombine.low %v1706_v61, %v1717_v63 }
 0x2b6   : > { %v1720_v3 = vpop.permute.xlu1 %1719 }
 0x2b7   : > { %v1728_v4 = vrot.slane %v1720_v3, %v3906_v33  ;;  %v1752_v36 = vshrl.u32 %v3045_v1, 16  ;;  %v1755_v38 = vshll.u32 %v3045_v1, 16 }
 0x2b8   : > { %v1993_v31 = vpop.permute.xlu0 %1992 }
 0x2b9   : > { %v3046_v5 = vcombine.low %v1728_v4, %v1739_v2  ;;  %v2001_v56 = vrot.slane %v1993_v31, %v3906_v33  ;;  %v1754_v41 = vrot.slane %v1752_v36, 4  ;;  %v1757_v61 = vrot.slane %v1755_v38, 5 }
 0x2bb   : > { %v1837_v59 = vpop.permute.xlu1 %1836  ;;  %v1760_v39 = vshrl.u32 %v3046_v5, 16  ;;  %v1763_v45 = vshll.u32 %v3046_v5, 16  ;;  %v3950_v5 = vor.u32 %v1679_v44, %v1676_v43 }
 0x2bc   : > { %v1845_v6 = vrot.slane %v1837_v59, %v3906_v33  ;;  %v2026_v60 = vpop.permute.xlu0 %2025 }
 0x2bd   : > { %v1762_v62 = vrot.slane %v1760_v39, 4  ;;  %v1765_v1 = vrot.slane %v1763_v45, 5  ;;  %v2034_v59 = vrot.slane %v2026_v60, %v3906_v33 }
 0x2be   : > { %v3050_v7 = vcombine.low %v1845_v6, %v1856_v55 }
 0x2bf   : > { %v1859_v8 = vpop.permute.xlu1 %1858 }
 0x2c0   : > { %v1867_v9 = vrot.slane %v1859_v8, %v3906_v33  ;;  %v1891_v53 = vshrl.u32 %v3050_v7, 16  ;;  %v1894_v57 = vshll.u32 %v3050_v7, 16 }
 0x2c2   : > { %v1893_v50 = vrot.slane %v1891_v53, 3  ;;  %v1896_v8 = vrot.slane %v1894_v57, 4 }
 0x2c3   : > { %v1870_v10 = vpop.permute.xlu1 %1869 }
 0x2c4   : > { %v1878_v11 = vrot.slane %v1870_v10, %v3906_v33  ;;  %v3955_v10 = vor.u32 %v1687_v51, %v1684_v49 }
 0x2c6   : > { %v3051_v12 = vcombine.low %v1867_v9, %v1878_v11  ;;  %v3957_v11 = vor.u32 %v1757_v61, %v1754_v41  ;;  %v3972_v26 = vsel %vm1672_vm4, %v3950_v5, %v3955_v10 }
 0x2c8   : > { %v1926_v15 = vpop.permute.xlu1 %1925  ;;  %v1899_v37 = vshrl.u32 %v3051_v12, 16  ;;  %v1902_v40 = vshll.u32 %v3051_v12, 16 }
 0x2c9   : > { %v1934_v17 = vrot.slane %v1926_v15, %v3906_v33 }
 0x2ca   : > { %v1901_v6 = vrot.slane %v1899_v37, 3  ;;  %v1904_v7 = vrot.slane %v1902_v40, 4 }
 0x2cb   : > { %v3052_v19 = vcombine.low %v1923_v14, %v1934_v17 }
 0x2cc   : > { %v1937_v20 = vpop.permute.xlu1 %1936 }
 0x2cd   : > { %v1945_v28 = vrot.slane %v1937_v20, %v3906_v33  ;;  %v1969_v63 = vshrl.u32 %v3052_v19, 16  ;;  %v1972_v2 = vshll.u32 %v3052_v19, 16  ;;  %v1487_v19 = vpop.permute.xlu0 %1486  ;;  %v3960_v20 = vor.u32 %v1765_v1, %v1762_v62 }
 0x2cf   : > { %v3053_v48 = vcombine.low %v1945_v28, %v1956_v29  ;;  %v1971_v12 = vrot.slane %v1969_v63, 2  ;;  %v1974_v14 = vrot.slane %v1972_v2, 3  ;;  %v3978_v29 = vsel %vm1750_vm6, %v3957_v11, %v3960_v20 }
 0x2d1   : > { %v3938_v21 = vpop.permute.xlu1 %1775  ;;  %v1977_v3 = vshrl.u32 %v3053_v48, 16  ;;  %v1980_v4 = vshll.u32 %v3053_v48, 16  ;;  %v3980_v31 = vor.u32 %v1974_v14, %v1971_v12  ;;  %v2057_v1 = vpop.permute.xlu0 %2056 }
 0x2d3   : > { %v1979_v15 = vrot.slane %v1977_v3, 2  ;;  %v1982_v17 = vrot.slane %v1980_v4, 3 }
 0x2d5   : > { %v1798_v24 = vpop.permute.xlu1 %1797  ;;  %v3983_v34 = vor.u32 %v1982_v17, %v1979_v15  ;;  %v2090_v3 = vpop.permute.xlu0 %2089 }
 0x2d6   : > { %v1806_v25 = vrot.slane %v1798_v24, %v3906_v33  ;;  %v3966_v24 = vor.u32 %v1896_v8, %v1893_v50  ;;  %v2065_v50 = vrot.slane %v2057_v1, %v3906_v33  ;;  %v3030_v8 = vld [vmem:[%s4543_s5] ss:$0 sm:$0xff] }
 0x2d7   : > { %v3999_v44 = vsel %vm1967_vm10, %v3980_v31, %v3983_v34 }
 0x2d8   : > { %v3944_v30 = vcombine.low %v1795_v23, %v1806_v25  ;;  %v1495_v23 = vrot.slane %v1487_v19, %v3906_v33  ;;  %v3968_v25 = vor.u32 %v1904_v7, %v1901_v6  ;;  %v2098_v6 = vrot.slane %v2090_v3, %v3906_v33 }
 0x2d9   : > { %v3946_v35 = vpop.permute.xlu1 %1808 }
 0x2da   : > { %v3994_v39 = vsel %vm1889_vm9, %v3966_v24, %v3968_v25  ;;  %vm1455_vm9 = vcmask 1043456  }
 0x2de   : > { %v2004_v58 = vpop.permute.xlu1 %2003 }
 0x2df   : > { %v2012_v0 = vrot.slane %v2004_v58, %v3906_v33 }
 0x2e1   : > { %v3952_v55 = vcombine.low %v2001_v56, %v2012_v0 }
 0x2e2   : > { %v2015_v9 = vpop.permute.xlu1 %2014 }
 0x2e3   : > { %v2023_v13 = vrot.slane %v2015_v9, %v3906_v33  ;;  %v2046_v16 = vrot.slane %v3952_v55, 2 }
 0x2e5   : > { %v3963_v22 = vcombine.low %v2023_v13, %v2034_v59 }
 0x2e7   : > { %v1475_v27 = vpop.permute.xlu1 %1474  ;;  %v2047_v28 = vrot.slane %v3963_v22, 2 }
 0x2e8   : > { %v1483_v32 = vrot.slane %v1475_v27, %v3906_v33 }
 0x2e9   : > { %v3990_v36 = vsel %vm2045_vm8, %v2046_v16, %v2047_v28 }
 0x2ea   : > { %v3039_v38 = vcombine.low %v1483_v32, %v1495_v23 }
 0x2eb   : > { %v1499_v43 = vpop.permute.xlu1 %1498 }
 0x2ec   : > { %v1507_v45 = vrot.slane %v1499_v43, %v3906_v33  ;;  %v1532_v37 = vshrl.u32 %v3039_v38, 16  ;;  %v1535_v40 = vshll.u32 %v3039_v38, 16 }
 0x2ee   : > { %v1534_v58 = vrot.slane %v1532_v37, 6  ;;  %v1537_v60 = vrot.slane %v1535_v40, 7 }
 0x2ef   : > { %v1511_v48 = vpop.permute.xlu1 %1510 }
 0x2f0   : > { %v1519_v49 = vrot.slane %v1511_v48, %v3906_v33  ;;  %v4005_v62 = vor.u32 %v1537_v60, %v1534_v58 }
 0x2f2   : > { %v3040_v51 = vcombine.low %v1507_v45, %v1519_v49 }
 0x2f4   : > { %v1540_v53 = vshrl.u32 %v3040_v51, 16  ;;  %v1543_v56 = vshll.u32 %v3040_v51, 16  ;;  %v2068_v0 = vpop.permute.xlu1 %2067 }
 0x2f5   : > { %v2076_v4 = vrot.slane %v2068_v0, %v3906_v33  ;;  %v4024_v0 = vrot.slane %v3946_v35, %v3906_v33 }
 0x2f6   : > { %v1542_v41 = vrot.slane %v1540_v53, 6  ;;  %v1545_v57 = vrot.slane %v1543_v56, 7 }
 0x2f7   : > { %v3056_v7 = vcombine.low %v2065_v50, %v2076_v4 }
 0x2f8   : > { %v4003_v61 = vor.u32 %v1545_v57, %v1542_v41  ;;  %v2079_v2 = vpop.permute.xlu1 %2078  ;;  %v4020_v41 = vrot.slane %v3938_v21, %v3906_v33 }
 0x2f9   : > { %v2087_v59 = vrot.slane %v2079_v2, %v3906_v33  ;;  %v2111_v14 = vshrl.u32 %v3056_v7, 16  ;;  %v2114_v15 = vshll.u32 %v3056_v7, 16 }
 0x2fa   : > { %v4009_v63 = vsel %vm1530_vm12, %v4005_v62, %v4003_v61  ;;  %vm2109_vm12 = vsmask.f32 6400  ;;  %v3047_v33 = vcombine.low %v4020_v41, %v4020_v41 }
 0x2fb   : > { %v3057_v9 = vcombine.low %v2087_v59, %v2098_v6  ;;  %v2113_v43 = vrot.slane %v2111_v14, 1  ;;  %v2116_v48 = vrot.slane %v2114_v15, 2 }
 0x2fd   : > { %v2119_v19 = vshrl.u32 %v3057_v9, 16  ;;  %v2122_v23 = vshll.u32 %v3057_v9, 16  ;;  %v2117_v1 = vor.u32 %v2116_v48, %v2113_v43 }
 0x2ff   : > { %v2121_v49 = vrot.slane %v2119_v19, 1  ;;  %v2124_v51 = vrot.slane %v2122_v23, 2 }
 0x301   : > { %v2125_v3 = vor.u32 %v2124_v51, %v2121_v49 }
 0x303   : > { %v2126_v9 = vsel %vm2109_vm12, %v2117_v1, %v2125_v3 }
 0x351   : > { %v3294_v12 = vpop.f32.mrf.mxu1 }
 0x352   : > { %v1433_v13 = vadd.f32 %v3294_v12, %v3030_v8  ;;  %v3049_v12 = vcombine.low %v4024_v0, %v4024_v0 }
 0x353   : > { %v1424_v17 = vpop.f32.mrf.mxu1 }
 0x354   : > { %v1425_v27 = vadd.f32 %v3030_v8, %v1424_v17  ;;  %v1445_v38 = vmul.f32 0.01, %v1433_v13  ;;  %vm1441_vm14 = vcmp.ge.f32.partialorder %v1433_v13, 0.0 }
 0x355   : > { %v3295_v32 = vpop.f32.mrf.mxu1 }
 0x356   : > { %v1436_v45 = vadd.f32 %v3295_v32, %v3030_v8  ;;  %v1443_v56 = vmul.f32 0.01, %v1425_v27  ;;  %vm1439_vm3 = vcmp.ge.f32.partialorder %v1425_v27, 0.0  ;;  %v1449_v57 = vsel %vm1441_vm14, %v1433_v13, %v1445_v38 }
 0x357   : > { %v1427_v53 = vpop.f32.mrf.mxu1  ;;  %vm2288_vm14 = vcmask 1042432  }
 0x358   : > { %vm1442_vm2 = vcmp.ge.f32.partialorder %v1436_v45, 0.0  ;;  %v1446_v37 = vmul.f32 0.01, %v1436_v45  ;;  %v1428_v40 = vadd.f32 %v3030_v8, %v1427_v53  ;;  %v1447_v4 = vsel %vm1439_vm3, %v1425_v27, %v1443_v56 }
 0x359   : > { %vm2227_vm3 = vcmask 1044480  }
 0x35a   : > { %v1450_v58 = vsel %vm1442_vm2, %v1436_v45, %v1446_v37  ;;  %vm1440_vm4 = vcmp.ge.f32.partialorder %v1428_v40, 0.0  ;;  %v1444_v60 = vmul.f32 0.01, %v1428_v40  ;;  %vm2166_vm2 = vcmask 1046528  }
 0x35b   : > { %v4026_v2 = vpack.c.bf16 %v1450_v58, %v1449_v57 }
 0x35c   : > { %v1448_v50 = vsel %vm1440_vm4, %v1428_v40, %v1444_v60  ;;  %vm2133_vm4 = vsmask.f32 7424 }
 0x35d   : > { %v4029_v21 = vrot.slane %v4026_v2, 4  ;;  %v4031_v59 = vpack.c.bf16 %v1448_v50, %v1447_v4  ;;  %v2621_v6 = vrot.slane %v4026_v2, 5  ;;  %v4035_v7 = vshrl.u32 %v4026_v2, 16 }
 0x35e   : > { %v2606_v14 = vrot.slane %v4026_v2, 2  ;;  %v2600_v15 = vrot.slane %v4026_v2, 1  ;;  %v2627_v17 = vrot.slane %v4026_v2, 6  ;;  %v2633_v32 = vrot.slane %v4026_v2, 7 }
 0x35f   : > { %v4041_v35 = vsel %vm1455_vm9, %v4029_v21, 0  ;;  %2622 = vrot.lane.b32.xlu0 %v2621_v6, %s3504_s27  ;;  %2598 = vrot.lane.b32.xlu1 %v4035_v7, %s4557_s12  ;;  %v4047_v8 = vrot.slane %v4031_v59, 4  ;;  %v2624_v27 = vrot.slane %v4035_v7, 5  ;;  %v4072_v45 = vshrl.u32 %v4031_v59, 16 }
 0x360   : > { %v2132_v13 = vmul.bf16 %v2125_v3, %v4041_v35  ;;  %v2618_v48 = vrot.slane %v4035_v7, 4  ;;  %v2603_v49 = vrot.slane %v4035_v7, 1  ;;  %v2547_v51 = vrot.slane %v4031_v59, 5 }
 0x361   : > { %v4059_v19 = vsel %vm1455_vm9, %v4047_v8, %v4029_v21  ;;  %v4063_v23 = vsel %vm1455_vm9, 0, %v4047_v8  ;;  %v2526_v40 = vrot.slane %v4031_v59, 1  ;;  %v1695_v57 = vmul.bf16 %v3955_v10, %v4041_v35 }
 0x362   : > { %v2130_v38 = vmul.bf16 %v2117_v1, %v4063_v23  ;;  %v2131_v43 = vmul.bf16 %v2126_v9, %v4059_v19  ;;  %v4077_v53 = vrot.slane %v2132_v13, 5  ;;  %v1773_v58 = vmul.bf16 %v3960_v20, %v4041_v35 }
 0x363   : > { %2607 = vrot.lane.b32.xlu0 %v2606_v14, %s4569_s21  ;;  %2601 = vrot.lane.b32.xlu1 %v2600_v15, %s3504_s27  ;;  %v1912_v60 = vmul.bf16 %v3968_v25, %v4041_v35  ;;  %v1990_v1 = vmul.bf16 %v3983_v34, %v4041_v35  ;;  %v1694_v50 = vmul.bf16 %v3972_v26, %v4059_v19  ;;  %v2630_v9 = vrot.slane %v4035_v7, 6 }
 0x364   : > { %v2289_v56 = vrot.slane %v2130_v38, 5  ;;  %v2290_v37 = vrot.slane %v2131_v43, 5  ;;  %v1693_v10 = vmul.bf16 %v3950_v5, %v4063_v23  ;;  %v4098_v13 = vrot.slane %v1695_v57, 1 }
 0x365   : > { %v4100_v14 = vrot.slane %v1773_v58, 2  ;;  %v4102_v15 = vrot.slane %v1912_v60, 3  ;;  %v4115_v60 = vrot.slane %v1990_v1, 4  ;;  %v1910_v1 = vmul.bf16 %v3966_v24, %v4063_v23 }
 0x366   : > { %v2291_v3 = vsel %vm2288_vm14, %v2289_v56, %v2290_v37  ;;  %v2293_v4 = vsel %vm2288_vm14, %v2290_v37, %v4077_v53  ;;  %v2168_v56 = vrot.slane %v1694_v50, 1  ;;  %v4108_v37 = vmul.bf16 %v3990_v36, %v4059_v19 }
 0x367   : > { %2628 = vrot.lane.b32.xlu1 %v2627_v17, %s4569_s21  ;;  %2625 = vrot.lane.b32.xlu0 %v2624_v27, %s4570_s18  ;;  %v2373_v20 = vshrl.u32 %v2291_v3, 16  ;;  %v2376_v25 = vshll.u32 %v2291_v3, 16  ;;  %v2381_v6 = vshrl.u32 %v2293_v4, 16  ;;  %v2384_v34 = vshll.u32 %v2293_v4, 16 }
 0x368   : > { %v2167_v17 = vrot.slane %v1693_v10, 1  ;;  %v1772_v27 = vmul.bf16 %v3978_v29, %v4059_v19  ;;  %v1771_v3 = vmul.bf16 %v3957_v11, %v4063_v23  ;;  %v4121_v29 = vsel %vm2166_vm2, %v2168_v56, %v4098_v13 }
 0x369   : > { %v2375_v26 = vrot.slane %v2373_v20, 1  ;;  %v2378_v38 = vrot.slane %v2376_v25, 2  ;;  %v2383_v43 = vrot.slane %v2381_v6, 1  ;;  %v2386_v5 = vrot.slane %v2384_v34, 2 }
 0x36a   : > { %v4124_v36 = vsel %vm2166_vm2, %v2167_v17, %v2168_v56  ;;  %v2182_v4 = vrot.slane %v1772_v27, 2  ;;  %v2181_v10 = vrot.slane %v1771_v3, 2  ;;  %v1989_v11 = vmul.bf16 %v3999_v44, %v4059_v19 }
 0x36b   : > { %2634 = vrot.lane.b32.xlu1 %v2633_v32, %s4559_s26  ;;  %2524 = vrot.lane.b32.xlu0 %v4072_v45, %s4557_s12  ;;  %v2379_v57 = vor.u32 %v2378_v38, %v2375_v26  ;;  %v4113_v58 = vor.u32 %v2386_v5, %v2383_v43  ;;  %v1911_v32 = vmul.bf16 %v3994_v39, %v4059_v19  ;;  %v2228_v44 = vrot.slane %v1910_v1, 3 }
 0x36c   : > { %v4137_v20 = vsel %vm2045_vm8, %v2182_v4, %v4100_v14  ;;  %v1988_v39 = vmul.bf16 %v3980_v31, %v4063_v23  ;;  %v1834_v6 = vmul.bf16 %v3049_v12, %v4041_v35  ;;  %v4148_v24 = vsel %vm2045_vm8, %v2181_v10, %v2182_v4 }
 0x36d   : > { %v2388_v50 = vsel %vm2109_vm12, %v2379_v57, %v4113_v58  ;;  %v2229_v25 = vrot.slane %v1911_v32, 3  ;;  %v2243_v34 = vrot.slane %v1989_v11, 4  ;;  %v4153_v26 = vmul.bf16 %v1610_v52, %v4041_v35 }
 0x36e   : > { %3067 = vmatprep.mubr.msk.bf16.mxu0 %vm1249_vm5, %v2388_v50  ;;  %v2242_v0 = vrot.slane %v1988_v39, 4  ;;  %v2210_v12 = vshrl.u32 %v1834_v6, 16  ;;  %v1616_v17 = vmul.bf16 %v3924_v54, %v4059_v19  ;;  %v2553_v27 = vrot.slane %v4031_v59, 6 }
 0x36f   : > { %2619 = vrot.lane.b32.xlu1 %v2618_v48, %s4557_s12  ;;  %2604 = vrot.lane.b32.xlu0 %v2603_v49, %s4570_s18  ;;  %v4157_v31 = vsel %vm2227_vm3, %v2229_v25, %v4102_v15  ;;  %v2213_v48 = vshll.u32 %v1834_v6, 16  ;;  %v2609_v49 = vrot.slane %v4035_v7, 2  ;;  %v4161_v38 = vsel %vm2227_vm3, %v2228_v44, %v2229_v25 }
 0x370   : > { %v4165_v43 = vsel %vm1455_vm9, %v2243_v34, %v4115_v60  ;;  %v2150_v47 = vshll.u32 %v4153_v26, 16  ;;  %v4169_v52 = vsel %vm1455_vm9, %v2242_v0, %v2243_v34  ;;  %v2212_v5 = vrot.slane %v2210_v12, 2 }
 0x371   : > { %v2215_v56 = vrot.slane %v2213_v48, 3  ;;  %v2054_v57 = vmul.bf16 %v2047_v28, %v4041_v35  ;;  %v1833_v3 = vmul.bf16 %v3944_v30, %v4059_v19  ;;  %v1615_v54 = vmul.bf16 %v1609_v46, %v4063_v23 }
 0x372   : > { %v2532_v4 = vrot.slane %v4031_v59, 2  ;;  %v2142_v32 = vshll.u32 %v1616_v17, 16  ;;  %v2146_v1 = vshrl.u32 %v1616_v17, 16  ;;  %v2262_v48 = vshrl.u32 %v4108_v37, 16 }
 0x373   : > { %2548 = vrot.lane.b32.xlu1 %v2547_v51, %s3504_s27  ;;  %2527 = vrot.lane.b32.xlu0 %v2526_v40, %s3504_s27  ;;  %v4189_v51 = vrot.slane %v2150_v47, 1  ;;  %v1832_v40 = vmul.bf16 %v3047_v33, %v4063_v23  ;;  %v4195_v50 = vor.u32 %v2215_v56, %v2212_v5  ;;  %v2271_v22 = vshrl.u32 %v2054_v57, 16 }
 0x374   : > { %v2274_v28 = vshll.u32 %v2054_v57, 16  ;;  %v2201_v10 = vshrl.u32 %v1833_v3, 16  ;;  %v2144_v30 = vrot.slane %v2142_v32, 1  ;;  %v2204_v11 = vshll.u32 %v1833_v3, 16 }
 0x375   : > { %v2137_v42 = vshll.u32 %v1615_v54, 16  ;;  %v2273_v46 = vrot.slane %v2271_v22, 4  ;;  %v2135_v39 = vshrl.u32 %v1615_v54, 16  ;;  %v2193_v41 = vshrl.u32 %v1832_v40, 16 }
 0x376   : > { %v2203_v25 = vrot.slane %v2201_v10, 2  ;;  %v2148_v33 = vor.u32 %v2146_v1, %v2144_v30  ;;  %v2206_v6 = vrot.slane %v2204_v11, 3  ;;  %v2196_v34 = vshll.u32 %v1832_v40, 16 }
 0x377   : > { %2631 = vrot.lane.b32.xlu1 %v2630_v9, %s4571_s20  ;;  %2610 = vrot.lane.b32.xlu0 %v2609_v49, %s4571_s20  ;;  %v2139_v44 = vrot.slane %v2137_v42, 1  ;;  %v2276_v0 = vrot.slane %v2274_v28, 5  ;;  %v2195_v12 = vrot.slane %v2193_v41, 2  ;;  %v2265_v47 = vshll.u32 %v4108_v37, 16  ;;  %v3413_v9 = vld [vmem:[%s4545_s7 + $0x38] sm:$0xff]  }
 0x378   : > { %v4208_v49 = vsel %vm2133_vm4, %v2148_v33, %v4189_v51  ;;  %v2207_v5 = vor.u32 %v2206_v6, %v2203_v25  ;;  %v2198_v17 = vrot.slane %v2196_v34, 3  ;;  %v2550_v57 = vrot.slane %v4072_v45, 5  ;;  %2469 = vmatpush1.bf16.msra.mxu0 %v3413_v9  ;;  %v3415_v9 = vld [vmem:[%s4545_s7 + $0x28] sm:$0xff]  }
 0x379   : > { %v2140_v56 = vor.u32 %v2139_v44, %v2135_v39  ;;  %v2264_v3 = vrot.slane %v2262_v48, 4  ;;  %v2267_v54 = vrot.slane %v2265_v47, 5  ;;  %v2052_v37 = vmul.bf16 %v2046_v16, %v4063_v23  ;;  %2470 = vmatprep.subr.bf16.mxu0 %v3516_v18  ;;  %v3414_v44 = vld [vmem:[%s4545_s7 + $0x30] sm:$0xff]  }
 0x37a   : > { %v2544_v32 = vrot.slane %v4072_v45, 4  ;;  %v4219_v40 = vsel %vm1967_vm10, %v2207_v5, %v4195_v50  ;;  %v1553_v42 = vmul.bf16 %v4003_v61, %v4041_v35  ;;  %v1551_v25 = vmul.bf16 %v4005_v62, %v4063_v23 }
 0x37b   : > { %2554 = vrot.lane.b32.xlu1 %v2553_v27, %s4569_s21  ;;  %2533 = vrot.lane.b32.xlu0 %v2532_v4, %s4569_s21  ;;  %v4222_v22 = vsel %vm2133_vm4, %v2140_v56, %v2144_v30  ;;  %v2199_v27 = vor.u32 %v2198_v17, %v2195_v12  ;;  %v4224_v4 = vor.u32 %v2276_v0, %v2273_v46  ;;  %v2254_v10 = vshrl.u32 %v2052_v37, 16  ;;  %v3431_v56 = vld [vmem:[%s4545_s7 + $0x40] sm:$0xff]  }
 0x37c   : > { %v2268_v28 = vor.u32 %v2267_v54, %v2264_v3  ;;  %v2257_v1 = vshll.u32 %v2052_v37, 16  ;;  %v1552_v46 = vmul.bf16 %v4009_v63, %v4059_v19  ;;  %v2398_v39 = vshrl.u32 %v4077_v53, 16  ;;  %2471 = vmatpush1.bf16.msra.mxu0 %v3414_v44  ;;  %v3434_v3 = vld [vmem:[%s4546_s8 + $0x48] sm:$0xff]  }
 0x37d   : > { %v4228_v55 = vsel %vm1967_vm10, %v2199_v27, %v2207_v5  ;;  %v2256_v30 = vrot.slane %v2254_v10, 4  ;;  %v2556_v41 = vrot.slane %v4072_v45, 6  ;;  %v2529_v33 = vrot.slane %v4072_v45, 1  ;;  %2472 = vmatprep.subr.bf16.mxu0 %v3516_v18  ;;  %v3432_v5 = vld [vmem:[%s4546_s8 + $0x50] sm:$0xff]   ;;  %v3437_v27 = vld [vmem:[%s4546_s8] sm:$0xff]  }
 0x37e   : > { %v4234_v16 = vsel %vm1750_vm6, %v2268_v28, %v4224_v4  ;;  %v2259_v11 = vrot.slane %v2257_v1, 5  ;;  %v2401_v34 = vshll.u32 %v4077_v53, 16  ;;  %v2400_v0 = vrot.slane %v2398_v39, 1 }
 0x37f   : > { %2551 = vrot.lane.b32.xlu1 %v2550_v57, %s4570_s18  ;;  %2545 = vrot.lane.b32.xlu0 %v2544_v32, %s4557_s12  ;;  %v2612_v17 = vrot.slane %v4026_v2, 3  ;;  %v3433_v57 = vld [vmem:[%s4546_s8 + $0x10] sm:$0xff]   ;;  %v2535_v54 = vrot.slane %v4072_v45, 2  ;;  %v2636_v37 = vrot.slane %v4035_v7, 7  ;;  %v3436_v32 = vld [vmem:[%s4546_s8 + $0x40] sm:$0xff]  }
 0x380   : > { %v2260_v6 = vor.u32 %v2259_v11, %v2256_v30  ;;  %v2403_v48 = vrot.slane %v2401_v34, 2  ;;  %2473 = vmatpush1.bf16.msra.mxu0 %v3415_v9 }
 0x381   : > { %2474 = vmatprep.subr.bf16.mxu0 %v3516_v18 }
 0x382   : > { %v4252_v12 = vsel %vm1750_vm6, %v2260_v6, %v2268_v28  ;;  %v2404_v47 = vor.u32 %v2403_v48, %v2400_v0  ;;  %v2538_v28 = vrot.slane %v4031_v59, 3  ;;  %vm2674_vm6 = vsmask.f32 256 }
 0x383   : > { %2557 = vrot.lane.b32.xlu1 %v2556_v41, %s4571_s20  ;;  %2530 = vrot.lane.b32.xlu0 %v2529_v33, %s4570_s18 }
 0x384   : > { %v4261_v53 = vsel %vm2109_vm12, %v4113_v58, %v2404_v47  ;;  %v2154_v58 = vshrl.u32 %v4153_v26, 16  ;;  %v3422_v26 = vld [vmem:[%s4545_s7 + $0x10] sm:$0xff]  }
 0x387   : > { %2176 = vrot.lane.b32.xlu0 %v4098_v13, %s3504_s27  ;;  %2190 = vrot.lane.b32.xlu1 %v4100_v14, %s4570_s18  ;;  %v3416_v13 = vld [vmem:[%s4545_s7 + $0x20] sm:$0xff]   ;;  %v3417_v14 = vld [vmem:[%s4546_s8 + $0x78] sm:$0xff]  }
 0x388   : > { %2475 = vmatpush1.bf16.msra.mxu0 %v3416_v13  ;;  %3152 = vmatprep.subr.bf16.mxu1 %v3417_v14 }
 0x389   : > { %2476 = vmatprep.subr.bf16.mxu0 %v3516_v18 }
 0x38b   : > { %2237 = vrot.lane.b32.xlu0 %v4102_v15, %s4571_s20  ;;  %2251 = vrot.lane.b32.xlu1 %v4115_v60, %s4559_s26  ;;  %v3418_v15 = vld [vmem:[%s4546_s8 + $0x38] sm:$0xff]   ;;  %v2156_v60 = vor.u32 %v2154_v58, %v4189_v51 }
 0x38c   : > { %3153 = vmatpush3.bf16.msra.mxu1 %v3418_v15  ;;  %v3429_v51 = vld [vmem:[%s4546_s8 + $0x58] sm:$0xff]  }
 0x38f   : > { %2174 = vrot.lane.b32.xlu0 %v4121_v29, %s3504_s27  ;;  %2172 = vrot.lane.b32.xlu1 %v4124_v36, %s3504_s27  ;;  %s4572_s27 = smov 96   ;;  %v3419_v29 = vld [vmem:[%s4545_s7 + $0x18] sm:$0xff]   ;;  %v3420_v36 = vld [vmem:[%s4546_s8 + $0x70] sm:$0xff]  }
 0x390   : > { %2477 = vmatpush1.bf16.msra.mxu0 %v3419_v29  ;;  %3154 = vmatprep.subr.bf16.mxu1 %v3420_v36 }
 0x391   : > { %2478 = vmatprep.subr.bf16.mxu0 %v3516_v18 }
 0x393   : > { %2188 = vrot.lane.b32.xlu0 %v4137_v20, %s4570_s18  ;;  %2186 = vrot.lane.b32.xlu1 %v4148_v24, %s4570_s18  ;;  %v3421_v20 = vld [vmem:[%s4546_s8 + $0x30] sm:$0xff]   ;;  %v3423_v24 = vld [vmem:[%s4546_s8 + $0x68] sm:$0xff]   ;;  %s3525_s18 = smov [#allocation2]  }
 0x394   : > { %3155 = vmatpush3.bf16.msra.mxu1 %v3421_v20  ;;  %2479 = vmatpush1.bf16.msra.mxu0 %v3422_v26 }
 0x395   : > { %3156 = vmatprep.subr.bf16.mxu1 %v3423_v24  ;;  %2480 = vmatprep.subr.bf16.mxu0 %v3516_v18 }
 0x397   : > { %2235 = vrot.lane.b32.xlu0 %v4157_v31, %s4571_s20  ;;  %2233 = vrot.lane.b32.xlu1 %v4161_v38, %s4571_s20  ;;  %v3424_v31 = vld [vmem:[%s4546_s8 + $0x28] sm:$0xff]   ;;  %v3426_v38 = vld [vmem:[%s4546_s8 + $0x60] sm:$0xff]  }
 0x398   : > { %3157 = vmatpush3.bf16.msra.mxu1 %v3424_v31 }
 0x399   : > { %3158 = vmatprep.subr.bf16.mxu1 %v3426_v38 }
 0x39b   : > { %2249 = vrot.lane.b32.xlu0 %v4165_v43, %s4572_s27  ;;  %2247 = vrot.lane.b32.xlu1 %v4169_v52, %s4572_s27  ;;  %v3425_v43 = vld [vmem:[%s4545_s7 + $0x8] sm:$0xff]   ;;  %v3427_v52 = vld [vmem:[%s4546_s8 + $0x20] sm:$0xff]  }
 0x39c   : > { %2481 = vmatpush1.bf16.msra.mxu0 %v3425_v43  ;;  %3159 = vmatpush3.bf16.msra.mxu1 %v3427_v52 }
 0x39d   : > { %2482 = vmatprep.subr.bf16.mxu0 %v3516_v18  ;;  %3160 = vmatprep.subr.bf16.mxu1 %v3429_v51 }
 0x39f   : > { %2222 = vrot.lane.b32.xlu0 %v4195_v50, %s4569_s21  ;;  %2161 = vrot.lane.b32.xlu1 %v2156_v60, %s4573_s1  ;;  %v3428_v50 = vld [vmem:[%s4545_s7] sm:$0xff]  }
 0x3a0   : > { %2483 = vmatpush1.bf16.msra.mxu0 %v3428_v50 }
 0x3a1   : > { %2498 = vmatprep.subr.bf16.mxu0 %v3516_v18  ;;  %v3435_v18 = vld [vmem:[%s4546_s8 + $0x8] sm:$0xff]  }
 0x3a3   : > { %2159 = vrot.lane.b32.xlu0 %v4208_v49, %s4573_s1  ;;  %2283 = vrot.lane.b32.xlu1 %v4224_v4, %s4574_s0  ;;  %v3430_v49 = vld [vmem:[%s4546_s8 + $0x18] sm:$0xff]   ;;  %v2562_v4 = vrot.slane %v4072_v45, 7 }
 0x3a4   : > { %3161 = vmatpush3.bf16.msra.mxu1 %v3430_v49  ;;  %2499 = vmatpush2.bf16.msra.mxu0 %v3431_v56 }
 0x3a5   : > { %3162 = vmatprep.subr.bf16.mxu1 %v3432_v5 }
 0x3a7   : > { %2220 = vrot.lane.b32.xlu0 %v4219_v40, %s4569_s21  ;;  %2157 = vrot.lane.b32.xlu1 %v4222_v22, %s4573_s1  ;;  %v2615_v40 = vrot.slane %v4035_v7, 3  ;;  %v2559_v22 = vrot.slane %v4031_v59, 7  ;;  %v2541_v7 = vrot.slane %v4072_v45, 3 }
 0x3a8   : > { %3163 = vmatpush3.bf16.msra.mxu1 %v3433_v57 }
 0x3a9   : > { %3164 = vmatprep.subr.bf16.mxu1 %v3434_v3 }
 0x3ab   : > { %2218 = vrot.lane.b32.xlu1 %v4228_v55, %s4569_s21  ;;  %2281 = vrot.lane.b32.xlu0 %v4234_v16, %s4574_s0  ;;  %s3086_s21 = sshll.u32 %s3602_s17, 5  ;;  %s2853_s17 = scalar_lea.sflag [#allocation3], %s358_s30 }
 0x3ac   : > { %3165 = vmatpush3.bf16.msra.mxu1 %v3435_v18  ;;  %s4497_s28 = scalar_lea.hbm %s4548_s10, %s3086_s21 }
 0x3ad   : > { %3166 = vmatprep.subr.bf16.mxu1 %v3436_v32 }
 0x3af   : > { %2613 = vrot.lane.b32.xlu0 %v2612_v17, %s4572_s27  ;;  %2279 = vrot.lane.b32.xlu1 %v4252_v12, %s4574_s0 }
 0x3b0   : > { %3167 = vmatpush3.bf16.msra.mxu1 %v3437_v27 }
 0x3b3   : > { %2536 = vrot.lane.b32.xlu0 %v2535_v54, %s4571_s20  ;;  %2637 = vrot.lane.b32.xlu1 %v2636_v37, %s4574_s0  ;;  %s3090_s20 = sshll.u32 %s3637_s29, 5  ;;  %s2869_s29 = sshll.u32 %s360_s11, 4  ;;  %s4499_s29 = int_to_ptr.vmem [resolvable:$true] %s2869_s29 }
 0x3b4   : > { %s370_s25 = scalar_lea.vmem %s4547_s9, %s3090_s20  ;;  %s3438_s1 = scalar_lea.vmem %s4499_s29, 32 }
 0x3b5   : > { %p3439_p11 = scmp.ne.s32.totalorder %s4499_s29, %s3438_s1  ;;  %s3442_s20 = sshll.u32 %s3525_s18, 4  ;;  %s3443_s20 = int_to_ptr.vmem [resolvable:$false] %s3442_s20 }
 0x3b6   : > { %p3445_p0 = scmp.lt.s32.totalorder %s4499_s29, %s3443_s20 }
 0x3b7   : > { %2616 = vrot.lane.b32.xlu0 %v2615_v40, %s4574_s0  ;;  %2560 = vrot.lane.b32.xlu1 %v2559_v22, %s4572_s27  ;;  %p3440_p12 = pnand %p3439_p11, %p3619_p5 }
 0x3b9   : > { %p3441_p13 = pneg %p3440_p12 }
 0x3bb   : > { %2563 = vrot.lane.b32.xlu0 %v2562_v4, %s4574_s0  ;;  %2539 = vrot.lane.b32.xlu1 %v2538_v28, %s4572_s27  ;;  %s3444_s27 = scalar_lea.vmem %s3443_s20, 64 }
 0x3bc   : > { %p3446_p1 = scmp.lt.s32.totalorder %s3444_s27, %s3438_s1 }
 0x3be   : > { %p3447_p2 = por %p3446_p1, %p3445_p0 }
 0x3bf   : > { %2542 = vrot.lane.b32.xlu1 %v2541_v7, %s4574_s0 }
 0x3c0   : > { %p3448_p3 = pnand %p3447_p2, %p3441_p13 }
 0x3d1   : > { %v2599_v10 = vpop.permute.xlu1 %2598  ;;  %v2623_v1 = vpop.permute.xlu0 %2622 }
 0x3d2   : > { %v2640_v55 = vsel %vm1249_vm5, %v4026_v2, %v2599_v10 }
 0x3d5   : > { %v2602_v16 = vpop.permute.xlu1 %2601  ;;  %v2608_v30 = vpop.permute.xlu0 %2607 }
 0x3d6   : > { %v2642_v11 = vsel %vm1259_vm7, %v2640_v55, %v2602_v16 }
 0x3d9   : > { %v2629_v39 = vpop.permute.xlu1 %2628  ;;  %v2626_v41 = vpop.permute.xlu0 %2625 }
 0x3dd   : > { %v2635_v33 = vpop.permute.xlu1 %2634  ;;  %v2525_v6 = vpop.permute.xlu0 %2524 }
 0x3de   : > { %v2566_v47 = vsel %vm1249_vm5, %v4031_v59, %v2525_v6 }
 0x3e1   : > { %v2620_v44 = vpop.permute.xlu1 %2619  ;;  %v2605_v34 = vpop.permute.xlu0 %2604 }
 0x3e2   : > { %v2654_v45 = vsel %vm1249_vm5, %v4029_v21, %v2620_v44  ;;  %v2644_v0 = vsel %vm459_vm0, %v2642_v11, %v2605_v34 }
 0x3e3   : > { %v2656_v12 = vsel %vm1259_vm7, %v2654_v45, %v2623_v1  ;;  %v2646_v48 = vsel %vm749_vm1, %v2644_v0, %v2608_v30 }
 0x3e4   : > { %v2658_v2 = vsel %vm459_vm0, %v2656_v12, %v2626_v41 }
 0x3e5   : > { %v4404_v9 = vpop.permute.xlu1 %2548  ;;  %v2528_v13 = vpop.permute.xlu0 %2527  ;;  %v2660_v14 = vsel %vm749_vm1, %v2658_v2, %v2629_v39 }
 0x3e6   : > { %v2568_v15 = vsel %vm1259_vm7, %v2566_v47, %v2528_v13 }
 0x3e9   : > { %v2632_v58 = vpop.permute.xlu1 %2631  ;;  %v2611_v21 = vpop.permute.xlu0 %2610 }
 0x3ea   : > { %v2662_v60 = vsel %vm1287_vm11, %v2660_v14, %v2632_v58  ;;  %v4410_v29 = vsel %vm1287_vm11, %v2646_v48, %v2611_v21 }
 0x3eb   : > { %v4413_v36 = vsel %vm1297_vm13, %v2662_v60, %v2635_v33 }
 0x3ed   : > { %v4415_v20 = vpop.permute.xlu1 %2554  ;;  %v2534_v59 = vpop.permute.xlu0 %2533 }
 0x3f1   : > { %v4417_v24 = vpop.permute.xlu1 %2551  ;;  %v2546_v26 = vpop.permute.xlu0 %2545 }
 0x3f2   : > { %v2581_v12 = vsel %vm1249_vm5, %v4047_v8, %v2546_v26 }
 0x3f5   : > { %v4419_v31 = vpop.permute.xlu1 %2557  ;;  %v2531_v38 = vpop.permute.xlu0 %2530 }
 0x3f6   : > { %v2570_v43 = vsel %vm459_vm0, %v2568_v15, %v2531_v38 }
 0x3f7   : > { %v4423_v52 = vsel %vm749_vm1, %v2570_v43, %v2534_v59  ;;  %v2583_v59 = vsel %vm1259_vm7, %v2581_v12, %v4404_v9 }
 0x3f9   : > { %v2191_v51 = vpop.permute.xlu1 %2190  ;;  %v2177_v50 = vpop.permute.xlu0 %2176 }
 0x3fd   : > { %v2252_v49 = vpop.permute.xlu1 %2251  ;;  %v2238_v5 = vpop.permute.xlu0 %2237 }
 0x401   : > { %v2173_v56 = vpop.permute.xlu1 %2172  ;;  %v2175_v17 = vpop.permute.xlu0 %2174 }
 0x405   : > { %v2187_v57 = vpop.permute.xlu1 %2186  ;;  %v2189_v3 = vpop.permute.xlu0 %2188 }
 0x409   : > { %v2234_v54 = vpop.permute.xlu1 %2233  ;;  %v2236_v37 = vpop.permute.xlu0 %2235 }
 0x40d   : > { %v2248_v18 = vpop.permute.xlu1 %2247  ;;  %v2250_v32 = vpop.permute.xlu0 %2249 }
 0x411   : > { %v2162_v40 = vpop.permute.xlu1 %2161  ;;  %v2223_v22 = vpop.permute.xlu0 %2222 }
 0x412   : > { %v2302_v27 = vsel %vm1249_vm5, %v1553_v42, %v2162_v40 }
 0x413   : > { %v2308_v4 = vsel %vm1259_vm7, %v2302_v27, %v2177_v50 }
 0x414   : > { %v2314_v28 = vsel %vm459_vm0, %v2308_v4, %v2191_v51 }
 0x415   : > { %v2320_v7 = vsel %vm749_vm1, %v2314_v28, %v2223_v22  ;;  %v2284_v10 = vpop.permute.xlu1 %2283  ;;  %v2160_v1 = vpop.permute.xlu0 %2159 }
 0x416   : > { %v2326_v55 = vsel %vm1287_vm11, %v2320_v7, %v2238_v5  ;;  %v2299_v16 = vsel %vm1249_vm5, %v1552_v46, %v2160_v1 }
 0x417   : > { %v2332_v30 = vsel %vm1297_vm13, %v2326_v55, %v2252_v49  ;;  %v2306_v61 = vsel %vm1259_vm7, %v2299_v16, %v2175_v17 }
 0x418   : > { %v2338_v35 = vsel %vm1307_vm15, %v2332_v30, %v2284_v10  ;;  %v2312_v42 = vsel %vm459_vm0, %v2306_v61, %v2189_v3 }
 0x419   : > { %v2158_v11 = vpop.permute.xlu1 %2157  ;;  %v2221_v39 = vpop.permute.xlu0 %2220  ;;  %v2389_v41 = vshrl.u32 %v2338_v35, 16  ;;  %v2392_v19 = vshll.u32 %v2338_v35, 16 }
 0x41a   : > { %v2296_v33 = vsel %vm1249_vm5, %v1551_v25, %v2158_v11  ;;  %v2318_v63 = vsel %vm749_vm1, %v2312_v42, %v2221_v39 }
 0x41b   : > { %v2304_v46 = vsel %vm1259_vm7, %v2296_v33, %v2173_v56  ;;  %v2324_v6 = vsel %vm1287_vm11, %v2318_v63, %v2236_v37  ;;  %v2391_v48 = vrot.slane %v2389_v41, 1  ;;  %v2394_v25 = vrot.slane %v2392_v19, 2 }
 0x41c   : > { %v2310_v44 = vsel %vm459_vm0, %v2304_v46, %v2187_v57  ;;  %v2330_v34 = vsel %vm1297_vm13, %v2324_v6, %v2250_v32  ;;  %v2585_v57 = vsel %vm459_vm0, %v2583_v59, %v4417_v24  ;;  %vm2673_vm7 = vcmask 1040384  }
 0x41d   : > { %v2219_v45 = vpop.permute.xlu1 %2218  ;;  %v2282_v0 = vpop.permute.xlu0 %2281  ;;  %v2395_v26 = vor.u32 %v2394_v25, %v2391_v48  ;;  %vm4471_vm0 = vmand %vm2673_vm7, %vm2674_vm6 }
 0x41e   : > { %v2316_v62 = vsel %vm749_vm1, %v2310_v44, %v2219_v45  ;;  %v2336_v23 = vsel %vm1307_vm15, %v2330_v34, %v2282_v0 }
 0x41f   : > { %v2322_v2 = vsel %vm1287_vm11, %v2316_v62, %v2234_v54  ;;  %v2364_v47 = vshrl.u32 %v2336_v23, 16  ;;  %v2367_v13 = vshll.u32 %v2336_v23, 16  ;;  %v2587_v54 = vsel %vm749_vm1, %v2585_v57, %v4415_v20 }
 0x420   : > { %v2328_v14 = vsel %vm1297_vm13, %v2322_v2, %v2248_v18  ;;  %v2589_v24 = vsel %vm1287_vm11, %v2587_v54, %v4419_v31 }
 0x421   : > { %v2366_v15 = vrot.slane %v2364_v47, 1  ;;  %v2369_v58 = vrot.slane %v2367_v13, 2  ;;  %v2280_v21 = vpop.permute.xlu1 %2279  ;;  %v2614_v60 = vpop.permute.xlu0 %2613 }
 0x422   : > { %v2334_v8 = vsel %vm1307_vm15, %v2328_v14, %v2280_v21  ;;  %v2650_v20 = vsel %vm1297_vm13, %v4410_v29, %v2614_v60 }
 0x423   : > { %v2370_v38 = vor.u32 %v2369_v58, %v2366_v15  ;;  %v2357_v43 = vshrl.u32 %v2334_v8, 16  ;;  %v2360_v51 = vshll.u32 %v2334_v8, 16 }
 0x425   : > { %v2359_v50 = vrot.slane %v2357_v43, 1  ;;  %v2362_v49 = vrot.slane %v2360_v51, 2  ;;  %v2638_v5 = vpop.permute.xlu1 %2637  ;;  %v2537_v56 = vpop.permute.xlu0 %2536  ;;  %v2396_v17 = vsel %vm2109_vm12, %v2370_v38, %v2395_v26 }
 0x426   : > { %v2666_v32 = vsel %vm1307_vm15, %v4413_v36, %v2638_v5  ;;  %v2574_v7 = vsel %vm1287_vm11, %v4423_v52, %v2537_v56 }
 0x427   : > { %v2363_v3 = vor.u32 %v2362_v49, %v2359_v50  ;;  %v2669_v22 = vshll.u32 %v2666_v32, 16 }
 0x429   : > { %v2561_v9 = vpop.permute.xlu1 %2560  ;;  %v2617_v37 = vpop.permute.xlu0 %2616  ;;  %v2371_v18 = vsel %vm2109_vm12, %v2363_v3, %v2370_v38 }
 0x42a   : > { %2501 = vmatmul.mubr.bf16.vlgmr.msra.gmra.mxu0 %v2371_v18  ;;  %v2591_v27 = vsel %vm1297_vm13, %v2589_v24, %v2561_v9  ;;  %v2652_v28 = vsel %vm1307_vm15, %v2650_v20, %v2617_v37 }
 0x42b   : > { %3068 = vmatprep.mubr.msk.bf16.mxu0 %vm1249_vm5, %v4261_v53  ;;  %v2667_v10 = vshll.u32 %v2652_v28, 16 }
 0x42d   : > { %v2540_v4 = vpop.permute.xlu1 %2539  ;;  %v2564_v36 = vpop.permute.xlu0 %2563 }
 0x42e   : > { %v2593_v53 = vsel %vm1307_vm15, %v2591_v27, %v2564_v36  ;;  %v2576_v29 = vsel %vm1297_vm13, %v2574_v7, %v2540_v4 }
 0x42f   : > { %v2677_v31 = vsel %vm4471_vm0, %v2593_v53, %v2669_v22 }
 0x430   : > { %2838 = vmatprep.mubr.bf16.mxu1 %v2677_v31 }
 0x431   : > { %v2543_v1 = vpop.permute.xlu1 %2542 }
 0x432   : > { %v2578_v55 = vsel %vm1307_vm15, %v2576_v29, %v2543_v1  ;;  %2509 = vmatmul.mubr.bf16.gmra.mxu0 %v2396_v17 }
 0x433   : > { %v2676_v16 = vsel %vm4471_vm0, %v2578_v55, %v2667_v10 }
 0x434   : > { %2839 = vmatmul.mubr.bf16.vlgmr.msra.gmra.mxu1 %v2676_v16 }
 0x4ea   : > { %v2502_v30 = vpop.f32.mrf.mxu0 }
 0x4eb   : > { %2517 = vst [vmem:[%s370_s25] sm:$0xff] %v2502_v30 }
 0x4ec   : > { %v2504_v52 = vpop.f32.mrf.mxu0 }
 0x4ee   : > { %v2505_v61 = vpop.f32.mrf.mxu0 }
 0x4ef   : > { %2518 = vst [vmem:[%s370_s25 + $0x8] sm:$0xff] %v2505_v61 }
 0x4f0   : > { %v2507_v35 = vpop.f32.mrf.mxu0 }
 0x4f2   : > { %v2510_v42 = vpop.f32.mrf.mxu0 }
 0x4f3   : > { %2519 = vst [vmem:[%s370_s25 + $0x10] sm:$0xff] %v2510_v42 }
 0x4f4   : > { %v2512_v11 = vpop.f32.mrf.mxu0  ;;  %v3168_v39 = vpop.f32.mrf.mxu1 }
 0x4f6   : > { %v2513_v41 = vpop.f32.mrf.mxu0  ;;  %v3169_v33 = vpop.f32.mrf.mxu1 }
 0x4f7   : > { %2520 = vst [vmem:[%s370_s25 + $0x18] sm:$0xff] %v2513_v41  ;;  %v3170_v63 = vadd.f32 %v3169_v33, %v3168_v39 }
 0x4f8   : > { %v2515_v19 = vpop.f32.mrf.mxu0  ;;  %v3171_v46 = vpop.f32.mrf.mxu1 }
 0x4f9   : > { %2846 = vst [vmem:[%s360_s11] sm:$0x3] %v3170_v63 }
 0x4fa   : > { %v3172_v6 = vpop.f32.mrf.mxu1 }
 0x4fb   : > { %3451 = shalt.err (!%p3448_p3)
}
 0x4fc   : > { %s3452_s0 = scalar_lea.hbm %s4497_s28, 32  ;;  %s3456_s2 = scalar_lea.hbm %s4548_s10, 64 }
 0x4fd   : > { %p3453_p4 = scmp.ne.s32.totalorder %s4497_s28, %s3452_s0  ;;  %p3457_p9 = scmp.lt.s32.totalorder %s4497_s28, %s4548_s10 }
 0x4fe   : > { %p3458_p10 = scmp.lt.s32.totalorder %s3456_s2, %s3452_s0 }
 0x4ff   : > { %p3454_p7 = pnand %p3453_p4, %p3619_p5 }
 0x500   : > { %p3459_p11 = por %p3458_p10, %p3457_p9 }
 0x501   : > { %p3455_p8 = pneg %p3454_p7 }
 0x503   : > { %p3460_p12 = pnand %p3459_p11, %p3455_p8 }
 0x505   : > { %3463 = shalt.err (!%p3460_p12)
}
 0x506   : > { %3296 = dma.vmem_to_hbm [thread:$0]  (%p3619_p5), %s4499_s29, 32, %s4497_s28, %s2853_s17  }
 0x507 PF: > { %p3302_p13 = scmp.ge.s32.totalorder %s3498_s16, 2  ;;  %s2889_s12 = sand.u32 1, %s3486_s13  }
 0x508   : > { %s2890_s26 = scalar_lea.sflag [#allocation3], %s2889_s12 }
 0x509   : > { %p3299_p0 = pnand %p3302_p13, %p3623_p6 }
 0x50b   : > { %p3300_p1 = pneg %p3299_p0 }
 0x50d   : > { %3481 = dma.done.wait (%p3300_p1), %s2890_s26, 32  }
 0x50e   : > { %3483 = vsyncadd (%p3300_p1), %s2890_s26, 4294967264  ;;  %p21_p2 = scmp.ge.s32.totalorder %s3606_s19, 4   ;;  %s4577_s13 = smov %s3490_s14 }
 0x50f   : > { %s4578_s14 = smov %s3494_s15  ;;  %s4579_s15 = smov %s3617_s22 }
 0x510   : > { %s4580_s16 = smov %s3606_s19  ;;  %23 = sbr.rel (!%p21_p2) target bundleno = 7 (0x7), region = 103 }
 0x515   :  { %2895 = vsyncpa [#allocation3], 1 }
 0x516   :  { %2897 = vsyncpa [#allocation3 + $0x1], 1 }

</bundles_post_ra>
